<compile_context>
chip_gen: v7x
topology: tpu7x:2x2x1
jax: 0.10.0
libtpu: 0.0.40
codegen_flags: <defaults>
</compile_context>

<pallas_src>
import functools

import jax
import jax.numpy as jnp
from jax.experimental import pallas as pl
from jax.experimental.pallas import tpu as pltpu


# ------------------------------ Pallas kernel ------------------------------ #

def _flat_gcn_kernel(a_ref, x_ref, e_ref, oh_src_ref, oh_dst_ref,
                     gcn_w_ref, gcn_b_ref,
                     edge_w_ref, edge_b_ref,
                     out_w0_ref, out_b0_ref,
                     out_w_ref, out_b_ref,
                     fin_w_ref, fin_b_ref,
                     o_ref,
                     *, n_gcn, n_edge, n_out):
    f32 = jnp.float32
    a = a_ref[...]                       # A_hat loaded once, reused for all layers

    # ---- fused GCN stack: h never leaves VMEM between layers ----
    h = x_ref[...]
    for l in range(n_gcn):               # static trip count -> fully unrolled
        xw = jnp.dot(h, gcn_w_ref[l], preferred_element_type=f32)
        h = jnp.maximum(jnp.dot(a, xw, preferred_element_type=f32) + gcn_b_ref[l], 0.0)

    # ---- fused edge-FC stack ----
    e = e_ref[...]
    for l in range(n_edge):
        e = jnp.maximum(jnp.dot(e, edge_w_ref[l], preferred_element_type=f32)
                        + edge_b_ref[l], 0.0)

    # ---- gather h[src], h[dst] via one-hot matmuls (rides the MXU) ----
    h_src = jnp.dot(oh_src_ref[...], h, preferred_element_type=f32)
    h_dst = jnp.dot(oh_dst_ref[...], h, preferred_element_type=f32)

    # ---- first out-FC layer: concat([h_src, h_dst, e]) @ W1 folded into
    #      three row-block matmuls summed together ----
    f = (jnp.dot(h_src, out_w0_ref[0], preferred_element_type=f32)
         + jnp.dot(h_dst, out_w0_ref[1], preferred_element_type=f32)
         + jnp.dot(e, out_w0_ref[2], preferred_element_type=f32)
         + out_b0_ref[...])
    f = jnp.maximum(f, 0.0)

    # ---- remaining out-FC layers ----
    for l in range(n_out - 1):
        f = jnp.maximum(jnp.dot(f, out_w_ref[l], preferred_element_type=f32)
                        + out_b_ref[l], 0.0)

    # ---- final layer, written into a lane-dense (128-wide) output slab ----
    o_ref[...] = (jnp.dot(f, fin_w_ref[...], preferred_element_type=f32)
                  + fin_b_ref[...]).astype(o_ref.dtype)


def _vmem_spec():
    return pl.BlockSpec(memory_space=pltpu.MemorySpace.VMEM)


def flat_gcn_forward(packed, a_hat, x_pad, e_pad, oh_src, oh_dst,
                     *, n_gcn, n_edge, n_out, out_dim, out_pad=128):
    n_edges = e_pad.shape[0]
    kernel = functools.partial(_flat_gcn_kernel,
                               n_gcn=n_gcn, n_edge=n_edge, n_out=n_out)
    out = pl.pallas_call(
        kernel,
        out_shape=jax.ShapeDtypeStruct((n_edges, out_pad), jnp.float32),
        in_specs=[_vmem_spec() for _ in range(15)],
        out_specs=_vmem_spec(),
    )(a_hat, x_pad, e_pad, oh_src, oh_dst,
      packed["gcn_w"], packed["gcn_b"],
      packed["edge_w"], packed["edge_b"],
      packed["out_w0"], packed["out_b0"],
      packed["out_w"], packed["out_b"],
      packed["fin_w"], packed["fin_b"])
    return out[:, :out_dim]


# ------------------------------- model glue -------------------------------- #

def build_normalized_adjacency(src, dst, num_nodes):
    """Dense equivalent of torch_geometric gcn_norm: D^-1/2 (A + I) D^-1/2.
    A_hat[i, j] multiplies messages flowing j -> i (aggregation at dst)."""
    a = jnp.zeros((num_nodes, num_nodes), jnp.float32).at[dst, src].add(1.0)
    a = a + jnp.eye(num_nodes, dtype=jnp.float32)
    deg = a.sum(axis=1)
    d_inv_sqrt = jnp.where(deg > 0, 1.0 / jnp.sqrt(deg), 0.0)
    return d_inv_sqrt[:, None] * a * d_inv_sqrt[None, :]


def _pad_rows(w, rows):
    return jnp.zeros((rows, w.shape[1]), w.dtype).at[: w.shape[0]].set(w)


def _pad_cols(m, width):
    return jnp.zeros((m.shape[0], width), m.dtype).at[:, : m.shape[1]].set(m)


def pack_params(params, hidden, out_dim, out_pad=128):
    """Stack + zero-pad per-layer weights into uniform [L, H, H] tensors."""
    gcn_w = jnp.stack([_pad_rows(w, hidden) for (w, _) in params["gcn"]])
    gcn_b = jnp.stack([b.reshape(1, -1) for (_, b) in params["gcn"]])
    edge_w = jnp.stack([_pad_rows(w, hidden) for (w, _) in params["edge_fc"]])
    edge_b = jnp.stack([b.reshape(1, -1) for (_, b) in params["edge_fc"]])

    w0, b0 = params["out_fc"][0]                  # [3H, H] -> three [H, H] blocks
    out_w0 = jnp.stack([w0[0:hidden], w0[hidden:2 * hidden], w0[2 * hidden:3 * hidden]])
    out_b0 = b0.reshape(1, -1)
    out_w = jnp.stack([w for (w, _) in params["out_fc"][1:]])
    out_b = jnp.stack([b.reshape(1, -1) for (_, b) in params["out_fc"][1:]])

    wf, bf = params["final"]                      # pad out_dim -> 128 lanes
    fin_w = jnp.zeros((hidden, out_pad), wf.dtype).at[:, :out_dim].set(wf)
    fin_b = jnp.zeros((1, out_pad), bf.dtype).at[0, :out_dim].set(bf)
    return dict(gcn_w=gcn_w, gcn_b=gcn_b, edge_w=edge_w, edge_b=edge_b,
                out_w0=out_w0, out_b0=out_b0, out_w=out_w, out_b=out_b,
                fin_w=fin_w, fin_b=fin_b)


def flat_gcn_reference(params, a_hat, x, edge_attr, src, dst):
    """Pure-JAX reference (unpadded, per-layer) for correctness check."""
    h = x
    for w, b in params["gcn"]:
        h = jnp.maximum(a_hat @ (h @ w) + b, 0.0)
    e = edge_attr
    for w, b in params["edge_fc"]:
        e = jnp.maximum(e @ w + b, 0.0)
    feat = jnp.concatenate([h[src], h[dst], e], axis=1)
    for w, b in params["out_fc"]:
        feat = jnp.maximum(feat @ w + b, 0.0)
    w_f, b_f = params["final"]
    return feat @ w_f + b_f


# --------------------------------- driver ---------------------------------- #

if __name__ == "__main__":
    # small synthetic sizes consistent with the module
    N_NODES, N_EDGES = 16, 24
    IN_NODE_DIM, IN_EDGE_DIM, HIDDEN, OUT_DIM = 8, 6, 32, 4
    NODE_CONV_LAYER_NUM, EDGE_FC_LAYER_NUM, OUT_FC_LAYER_NUM = 4, 8, 4
    NODE_CONV_HEADS = 1
    OUT_PAD = 128

    key = jax.random.PRNGKey(0)
    keys = iter(jax.random.split(key, 64))

    x = jax.random.normal(next(keys), (N_NODES, IN_NODE_DIM), jnp.float32)
    src = jax.random.randint(next(keys), (N_EDGES,), 0, N_NODES)
    dst = jax.random.randint(next(keys), (N_EDGES,), 0, N_NODES)
    edge_attr = jax.random.normal(next(keys), (N_EDGES, IN_EDGE_DIM), jnp.float32)

    def init_linear(k, d_in, d_out):
        k1, k2 = jax.random.split(k)
        scale = 1.0 / jnp.sqrt(jnp.float32(d_in))
        w = jax.random.uniform(k1, (d_in, d_out), jnp.float32, -scale, scale)
        b = jax.random.uniform(k2, (d_out,), jnp.float32, -scale, scale)
        return w, b

    params = {"gcn": [], "edge_fc": [], "out_fc": []}
    d = IN_NODE_DIM
    for _ in range(NODE_CONV_LAYER_NUM):
        params["gcn"].append(init_linear(next(keys), d, HIDDEN))
        d = HIDDEN * NODE_CONV_HEADS
    d = IN_EDGE_DIM
    for _ in range(EDGE_FC_LAYER_NUM):
        params["edge_fc"].append(init_linear(next(keys), d, HIDDEN))
        d = HIDDEN
    d = HIDDEN * (2 * NODE_CONV_HEADS + 1)
    for _ in range(OUT_FC_LAYER_NUM):
        params["out_fc"].append(init_linear(next(keys), d, HIDDEN))
        d = HIDDEN
    params["final"] = init_linear(next(keys), HIDDEN, OUT_DIM)

    # host-side (one-time) prep: dense normalized adjacency, one-hot gather
    # operators, zero-padded inputs, stacked/padded weights.
    a_hat = build_normalized_adjacency(src, dst, N_NODES)
    oh_src = jax.nn.one_hot(src, N_NODES, dtype=jnp.float32)   # [E, N]
    oh_dst = jax.nn.one_hot(dst, N_NODES, dtype=jnp.float32)   # [E, N]
    x_pad = _pad_cols(x, HIDDEN)                               # [N, H]
    e_pad = _pad_cols(edge_attr, HIDDEN)                       # [E, H]
    packed = pack_params(params, HIDDEN, OUT_DIM, OUT_PAD)

    edge_pred = flat_gcn_forward(
        packed, a_hat, x_pad, e_pad, oh_src, oh_dst,
        n_gcn=NODE_CONV_LAYER_NUM, n_edge=EDGE_FC_LAYER_NUM,
        n_out=OUT_FC_LAYER_NUM, out_dim=OUT_DIM, out_pad=OUT_PAD)
    edge_pred = jax.block_until_ready(edge_pred)

    ref = flat_gcn_reference(params, a_hat, x, edge_attr, src, dst)
    assert edge_pred.shape == (N_EDGES, OUT_DIM)
    assert jnp.allclose(edge_pred, ref, rtol=1e-4, atol=1e-4)

    print("KERNEL_OK")
</pallas_src>

<mosaic_0001>
module attributes {stable_mosaic.version = 11 : i64} {
  func.func @_flat_gcn_kernel(%arg0: memref<16x16xf32, #tpu.memory_space<vmem>>, %arg1: memref<16x32xf32, #tpu.memory_space<vmem>>, %arg2: memref<24x32xf32, #tpu.memory_space<vmem>>, %arg3: memref<24x16xf32, #tpu.memory_space<vmem>>, %arg4: memref<24x16xf32, #tpu.memory_space<vmem>>, %arg5: memref<4x32x32xf32, #tpu.memory_space<vmem>>, %arg6: memref<4x1x32xf32, #tpu.memory_space<vmem>>, %arg7: memref<8x32x32xf32, #tpu.memory_space<vmem>>, %arg8: memref<8x1x32xf32, #tpu.memory_space<vmem>>, %arg9: memref<3x32x32xf32, #tpu.memory_space<vmem>>, %arg10: memref<1x32xf32, #tpu.memory_space<vmem>>, %arg11: memref<3x32x32xf32, #tpu.memory_space<vmem>>, %arg12: memref<3x1x32xf32, #tpu.memory_space<vmem>>, %arg13: memref<32x128xf32, #tpu.memory_space<vmem>>, %arg14: memref<1x128xf32, #tpu.memory_space<vmem>>, %arg15: memref<24x128xf32, #tpu.memory_space<vmem>>) attributes {dimension_semantics = [], scalar_prefetch = 0 : i64, scratch_operands = 0 : i64, tpu.core_type = #tpu.core_type<tc>} {
    %c0 = arith.constant 0 : index
    %c0_0 = arith.constant 0 : index
    %0 = vector.load %arg0[%c0, %c0_0] : memref<16x16xf32, #tpu.memory_space<vmem>>, vector<16x16xf32>
    %c0_1 = arith.constant 0 : index
    %c0_2 = arith.constant 0 : index
    %1 = vector.load %arg1[%c0_1, %c0_2] : memref<16x32xf32, #tpu.memory_space<vmem>>, vector<16x32xf32>
    %c0_3 = arith.constant 0 : index
    %c0_4 = arith.constant 0 : index
    %c0_5 = arith.constant 0 : index
    %2 = vector.load %arg5[%c0_3, %c0_4, %c0_5] : memref<4x32x32xf32, #tpu.memory_space<vmem>>, vector<1x32x32xf32>
    %3 = vector.shape_cast %2 : vector<1x32x32xf32> to vector<32x32xf32>
    %cst = arith.constant dense<0.000000e+00> : vector<16x32xf32>
    %4 = tpu.matmul %1, %3, %cst {dimension_numbers = #tpu.dot_dimension_numbers<[1], [0], [0], [1], [0, 0, 1, 1], [], []>} : vector<16x32xf32>, vector<32x32xf32>, vector<16x32xf32> -> vector<16x32xf32>
    %cst_6 = arith.constant dense<0.000000e+00> : vector<16x32xf32>
    %5 = tpu.matmul %0, %4, %cst_6 {dimension_numbers = #tpu.dot_dimension_numbers<[1], [0], [0], [1], [0, 0, 1, 1], [], []>} : vector<16x16xf32>, vector<16x32xf32>, vector<16x32xf32> -> vector<16x32xf32>
    %c0_7 = arith.constant 0 : index
    %c0_8 = arith.constant 0 : index
    %c0_9 = arith.constant 0 : index
    %6 = vector.load %arg6[%c0_7, %c0_8, %c0_9] : memref<4x1x32xf32, #tpu.memory_space<vmem>>, vector<1x1x32xf32>
    %7 = vector.shape_cast %6 : vector<1x1x32xf32> to vector<1x32xf32>
    %8 = vector.broadcast %7 : vector<1x32xf32> to vector<16x32xf32>
    %9 = arith.addf %5, %8 : vector<16x32xf32>
    %cst_10 = arith.constant 0.000000e+00 : f32
    %10 = vector.broadcast %cst_10 : f32 to vector<16x32xf32>
    %11 = arith.maximumf %9, %10 : vector<16x32xf32>
    %c1 = arith.constant 1 : index
    %c0_11 = arith.constant 0 : index
    %c0_12 = arith.constant 0 : index
    %12 = vector.load %arg5[%c1, %c0_11, %c0_12] : memref<4x32x32xf32, #tpu.memory_space<vmem>>, vector<1x32x32xf32>
    %13 = vector.shape_cast %12 : vector<1x32x32xf32> to vector<32x32xf32>
    %cst_13 = arith.constant dense<0.000000e+00> : vector<16x32xf32>
    %14 = tpu.matmul %11, %13, %cst_13 {dimension_numbers = #tpu.dot_dimension_numbers<[1], [0], [0], [1], [0, 0, 1, 1], [], []>} : vector<16x32xf32>, vector<32x32xf32>, vector<16x32xf32> -> vector<16x32xf32>
    %cst_14 = arith.constant dense<0.000000e+00> : vector<16x32xf32>
    %15 = tpu.matmul %0, %14, %cst_14 {dimension_numbers = #tpu.dot_dimension_numbers<[1], [0], [0], [1], [0, 0, 1, 1], [], []>} : vector<16x16xf32>, vector<16x32xf32>, vector<16x32xf32> -> vector<16x32xf32>
    %c1_15 = arith.constant 1 : index
    %c0_16 = arith.constant 0 : index
    %c0_17 = arith.constant 0 : index
    %16 = vector.load %arg6[%c1_15, %c0_16, %c0_17] : memref<4x1x32xf32, #tpu.memory_space<vmem>>, vector<1x1x32xf32>
    %17 = vector.shape_cast %16 : vector<1x1x32xf32> to vector<1x32xf32>
    %18 = vector.broadcast %17 : vector<1x32xf32> to vector<16x32xf32>
    %19 = arith.addf %15, %18 : vector<16x32xf32>
    %cst_18 = arith.constant 0.000000e+00 : f32
    %20 = vector.broadcast %cst_18 : f32 to vector<16x32xf32>
    %21 = arith.maximumf %19, %20 : vector<16x32xf32>
    %c2 = arith.constant 2 : index
    %c0_19 = arith.constant 0 : index
    %c0_20 = arith.constant 0 : index
    %22 = vector.load %arg5[%c2, %c0_19, %c0_20] : memref<4x32x32xf32, #tpu.memory_space<vmem>>, vector<1x32x32xf32>
    %23 = vector.shape_cast %22 : vector<1x32x32xf32> to vector<32x32xf32>
    %cst_21 = arith.constant dense<0.000000e+00> : vector<16x32xf32>
    %24 = tpu.matmul %21, %23, %cst_21 {dimension_numbers = #tpu.dot_dimension_numbers<[1], [0], [0], [1], [0, 0, 1, 1], [], []>} : vector<16x32xf32>, vector<32x32xf32>, vector<16x32xf32> -> vector<16x32xf32>
    %cst_22 = arith.constant dense<0.000000e+00> : vector<16x32xf32>
    %25 = tpu.matmul %0, %24, %cst_22 {dimension_numbers = #tpu.dot_dimension_numbers<[1], [0], [0], [1], [0, 0, 1, 1], [], []>} : vector<16x16xf32>, vector<16x32xf32>, vector<16x32xf32> -> vector<16x32xf32>
    %c2_23 = arith.constant 2 : index
    %c0_24 = arith.constant 0 : index
    %c0_25 = arith.constant 0 : index
    %26 = vector.load %arg6[%c2_23, %c0_24, %c0_25] : memref<4x1x32xf32, #tpu.memory_space<vmem>>, vector<1x1x32xf32>
    %27 = vector.shape_cast %26 : vector<1x1x32xf32> to vector<1x32xf32>
    %28 = vector.broadcast %27 : vector<1x32xf32> to vector<16x32xf32>
    %29 = arith.addf %25, %28 : vector<16x32xf32>
    %cst_26 = arith.constant 0.000000e+00 : f32
    %30 = vector.broadcast %cst_26 : f32 to vector<16x32xf32>
    %31 = arith.maximumf %29, %30 : vector<16x32xf32>
    %c3 = arith.constant 3 : index
    %c0_27 = arith.constant 0 : index
    %c0_28 = arith.constant 0 : index
    %32 = vector.load %arg5[%c3, %c0_27, %c0_28] : memref<4x32x32xf32, #tpu.memory_space<vmem>>, vector<1x32x32xf32>
    %33 = vector.shape_cast %32 : vector<1x32x32xf32> to vector<32x32xf32>
    %cst_29 = arith.constant dense<0.000000e+00> : vector<16x32xf32>
    %34 = tpu.matmul %31, %33, %cst_29 {dimension_numbers = #tpu.dot_dimension_numbers<[1], [0], [0], [1], [0, 0, 1, 1], [], []>} : vector<16x32xf32>, vector<32x32xf32>, vector<16x32xf32> -> vector<16x32xf32>
    %cst_30 = arith.constant dense<0.000000e+00> : vector<16x32xf32>
    %35 = tpu.matmul %0, %34, %cst_30 {dimension_numbers = #tpu.dot_dimension_numbers<[1], [0], [0], [1], [0, 0, 1, 1], [], []>} : vector<16x16xf32>, vector<16x32xf32>, vector<16x32xf32> -> vector<16x32xf32>
    %c3_31 = arith.constant 3 : index
    %c0_32 = arith.constant 0 : index
    %c0_33 = arith.constant 0 : index
    %36 = vector.load %arg6[%c3_31, %c0_32, %c0_33] : memref<4x1x32xf32, #tpu.memory_space<vmem>>, vector<1x1x32xf32>
    %37 = vector.shape_cast %36 : vector<1x1x32xf32> to vector<1x32xf32>
    %38 = vector.broadcast %37 : vector<1x32xf32> to vector<16x32xf32>
    %39 = arith.addf %35, %38 : vector<16x32xf32>
    %cst_34 = arith.constant 0.000000e+00 : f32
    %40 = vector.broadcast %cst_34 : f32 to vector<16x32xf32>
    %41 = arith.maximumf %39, %40 : vector<16x32xf32>
    %c0_35 = arith.constant 0 : index
    %c0_36 = arith.constant 0 : index
    %42 = vector.load %arg2[%c0_35, %c0_36] : memref<24x32xf32, #tpu.memory_space<vmem>>, vector<24x32xf32>
    %c0_37 = arith.constant 0 : index
    %c0_38 = arith.constant 0 : index
    %c0_39 = arith.constant 0 : index
    %43 = vector.load %arg7[%c0_37, %c0_38, %c0_39] : memref<8x32x32xf32, #tpu.memory_space<vmem>>, vector<1x32x32xf32>
    %44 = vector.shape_cast %43 : vector<1x32x32xf32> to vector<32x32xf32>
    %cst_40 = arith.constant dense<0.000000e+00> : vector<24x32xf32>
    %45 = tpu.matmul %42, %44, %cst_40 {dimension_numbers = #tpu.dot_dimension_numbers<[1], [0], [0], [1], [0, 0, 1, 1], [], []>} : vector<24x32xf32>, vector<32x32xf32>, vector<24x32xf32> -> vector<24x32xf32>
    %c0_41 = arith.constant 0 : index
    %c0_42 = arith.constant 0 : index
    %c0_43 = arith.constant 0 : index
    %46 = vector.load %arg8[%c0_41, %c0_42, %c0_43] : memref<8x1x32xf32, #tpu.memory_space<vmem>>, vector<1x1x32xf32>
    %47 = vector.shape_cast %46 : vector<1x1x32xf32> to vector<1x32xf32>
    %48 = vector.broadcast %47 : vector<1x32xf32> to vector<24x32xf32>
    %49 = arith.addf %45, %48 : vector<24x32xf32>
    %cst_44 = arith.constant 0.000000e+00 : f32
    %50 = vector.broadcast %cst_44 : f32 to vector<24x32xf32>
    %51 = arith.maximumf %49, %50 : vector<24x32xf32>
    %c1_45 = arith.constant 1 : index
    %c0_46 = arith.constant 0 : index
    %c0_47 = arith.constant 0 : index
    %52 = vector.load %arg7[%c1_45, %c0_46, %c0_47] : memref<8x32x32xf32, #tpu.memory_space<vmem>>, vector<1x32x32xf32>
    %53 = vector.shape_cast %52 : vector<1x32x32xf32> to vector<32x32xf32>
    %cst_48 = arith.constant dense<0.000000e+00> : vector<24x32xf32>
    %54 = tpu.matmul %51, %53, %cst_48 {dimension_numbers = #tpu.dot_dimension_numbers<[1], [0], [0], [1], [0, 0, 1, 1], [], []>} : vector<24x32xf32>, vector<32x32xf32>, vector<24x32xf32> -> vector<24x32xf32>
    %c1_49 = arith.constant 1 : index
    %c0_50 = arith.constant 0 : index
    %c0_51 = arith.constant 0 : index
    %55 = vector.load %arg8[%c1_49, %c0_50, %c0_51] : memref<8x1x32xf32, #tpu.memory_space<vmem>>, vector<1x1x32xf32>
    %56 = vector.shape_cast %55 : vector<1x1x32xf32> to vector<1x32xf32>
    %57 = vector.broadcast %56 : vector<1x32xf32> to vector<24x32xf32>
    %58 = arith.addf %54, %57 : vector<24x32xf32>
    %cst_52 = arith.constant 0.000000e+00 : f32
    %59 = vector.broadcast %cst_52 : f32 to vector<24x32xf32>
    %60 = arith.maximumf %58, %59 : vector<24x32xf32>
    %c2_53 = arith.constant 2 : index
    %c0_54 = arith.constant 0 : index
    %c0_55 = arith.constant 0 : index
    %61 = vector.load %arg7[%c2_53, %c0_54, %c0_55] : memref<8x32x32xf32, #tpu.memory_space<vmem>>, vector<1x32x32xf32>
    %62 = vector.shape_cast %61 : vector<1x32x32xf32> to vector<32x32xf32>
    %cst_56 = arith.constant dense<0.000000e+00> : vector<24x32xf32>
    %63 = tpu.matmul %60, %62, %cst_56 {dimension_numbers = #tpu.dot_dimension_numbers<[1], [0], [0], [1], [0, 0, 1, 1], [], []>} : vector<24x32xf32>, vector<32x32xf32>, vector<24x32xf32> -> vector<24x32xf32>
    %c2_57 = arith.constant 2 : index
    %c0_58 = arith.constant 0 : index
    %c0_59 = arith.constant 0 : index
    %64 = vector.load %arg8[%c2_57, %c0_58, %c0_59] : memref<8x1x32xf32, #tpu.memory_space<vmem>>, vector<1x1x32xf32>
    %65 = vector.shape_cast %64 : vector<1x1x32xf32> to vector<1x32xf32>
    %66 = vector.broadcast %65 : vector<1x32xf32> to vector<24x32xf32>
    %67 = arith.addf %63, %66 : vector<24x32xf32>
    %cst_60 = arith.constant 0.000000e+00 : f32
    %68 = vector.broadcast %cst_60 : f32 to vector<24x32xf32>
    %69 = arith.maximumf %67, %68 : vector<24x32xf32>
    %c3_61 = arith.constant 3 : index
    %c0_62 = arith.constant 0 : index
    %c0_63 = arith.constant 0 : index
    %70 = vector.load %arg7[%c3_61, %c0_62, %c0_63] : memref<8x32x32xf32, #tpu.memory_space<vmem>>, vector<1x32x32xf32>
    %71 = vector.shape_cast %70 : vector<1x32x32xf32> to vector<32x32xf32>
    %cst_64 = arith.constant dense<0.000000e+00> : vector<24x32xf32>
    %72 = tpu.matmul %69, %71, %cst_64 {dimension_numbers = #tpu.dot_dimension_numbers<[1], [0], [0], [1], [0, 0, 1, 1], [], []>} : vector<24x32xf32>, vector<32x32xf32>, vector<24x32xf32> -> vector<24x32xf32>
    %c3_65 = arith.constant 3 : index
    %c0_66 = arith.constant 0 : index
    %c0_67 = arith.constant 0 : index
    %73 = vector.load %arg8[%c3_65, %c0_66, %c0_67] : memref<8x1x32xf32, #tpu.memory_space<vmem>>, vector<1x1x32xf32>
    %74 = vector.shape_cast %73 : vector<1x1x32xf32> to vector<1x32xf32>
    %75 = vector.broadcast %74 : vector<1x32xf32> to vector<24x32xf32>
    %76 = arith.addf %72, %75 : vector<24x32xf32>
    %cst_68 = arith.constant 0.000000e+00 : f32
    %77 = vector.broadcast %cst_68 : f32 to vector<24x32xf32>
    %78 = arith.maximumf %76, %77 : vector<24x32xf32>
    %c4 = arith.constant 4 : index
    %c0_69 = arith.constant 0 : index
    %c0_70 = arith.constant 0 : index
    %79 = vector.load %arg7[%c4, %c0_69, %c0_70] : memref<8x32x32xf32, #tpu.memory_space<vmem>>, vector<1x32x32xf32>
    %80 = vector.shape_cast %79 : vector<1x32x32xf32> to vector<32x32xf32>
    %cst_71 = arith.constant dense<0.000000e+00> : vector<24x32xf32>
    %81 = tpu.matmul %78, %80, %cst_71 {dimension_numbers = #tpu.dot_dimension_numbers<[1], [0], [0], [1], [0, 0, 1, 1], [], []>} : vector<24x32xf32>, vector<32x32xf32>, vector<24x32xf32> -> vector<24x32xf32>
    %c4_72 = arith.constant 4 : index
    %c0_73 = arith.constant 0 : index
    %c0_74 = arith.constant 0 : index
    %82 = vector.load %arg8[%c4_72, %c0_73, %c0_74] : memref<8x1x32xf32, #tpu.memory_space<vmem>>, vector<1x1x32xf32>
    %83 = vector.shape_cast %82 : vector<1x1x32xf32> to vector<1x32xf32>
    %84 = vector.broadcast %83 : vector<1x32xf32> to vector<24x32xf32>
    %85 = arith.addf %81, %84 : vector<24x32xf32>
    %cst_75 = arith.constant 0.000000e+00 : f32
    %86 = vector.broadcast %cst_75 : f32 to vector<24x32xf32>
    %87 = arith.maximumf %85, %86 : vector<24x32xf32>
    %c5 = arith.constant 5 : index
    %c0_76 = arith.constant 0 : index
    %c0_77 = arith.constant 0 : index
    %88 = vector.load %arg7[%c5, %c0_76, %c0_77] : memref<8x32x32xf32, #tpu.memory_space<vmem>>, vector<1x32x32xf32>
    %89 = vector.shape_cast %88 : vector<1x32x32xf32> to vector<32x32xf32>
    %cst_78 = arith.constant dense<0.000000e+00> : vector<24x32xf32>
    %90 = tpu.matmul %87, %89, %cst_78 {dimension_numbers = #tpu.dot_dimension_numbers<[1], [0], [0], [1], [0, 0, 1, 1], [], []>} : vector<24x32xf32>, vector<32x32xf32>, vector<24x32xf32> -> vector<24x32xf32>
    %c5_79 = arith.constant 5 : index
    %c0_80 = arith.constant 0 : index
    %c0_81 = arith.constant 0 : index
    %91 = vector.load %arg8[%c5_79, %c0_80, %c0_81] : memref<8x1x32xf32, #tpu.memory_space<vmem>>, vector<1x1x32xf32>
    %92 = vector.shape_cast %91 : vector<1x1x32xf32> to vector<1x32xf32>
    %93 = vector.broadcast %92 : vector<1x32xf32> to vector<24x32xf32>
    %94 = arith.addf %90, %93 : vector<24x32xf32>
    %cst_82 = arith.constant 0.000000e+00 : f32
    %95 = vector.broadcast %cst_82 : f32 to vector<24x32xf32>
    %96 = arith.maximumf %94, %95 : vector<24x32xf32>
    %c6 = arith.constant 6 : index
    %c0_83 = arith.constant 0 : index
    %c0_84 = arith.constant 0 : index
    %97 = vector.load %arg7[%c6, %c0_83, %c0_84] : memref<8x32x32xf32, #tpu.memory_space<vmem>>, vector<1x32x32xf32>
    %98 = vector.shape_cast %97 : vector<1x32x32xf32> to vector<32x32xf32>
    %cst_85 = arith.constant dense<0.000000e+00> : vector<24x32xf32>
    %99 = tpu.matmul %96, %98, %cst_85 {dimension_numbers = #tpu.dot_dimension_numbers<[1], [0], [0], [1], [0, 0, 1, 1], [], []>} : vector<24x32xf32>, vector<32x32xf32>, vector<24x32xf32> -> vector<24x32xf32>
    %c6_86 = arith.constant 6 : index
    %c0_87 = arith.constant 0 : index
    %c0_88 = arith.constant 0 : index
    %100 = vector.load %arg8[%c6_86, %c0_87, %c0_88] : memref<8x1x32xf32, #tpu.memory_space<vmem>>, vector<1x1x32xf32>
    %101 = vector.shape_cast %100 : vector<1x1x32xf32> to vector<1x32xf32>
    %102 = vector.broadcast %101 : vector<1x32xf32> to vector<24x32xf32>
    %103 = arith.addf %99, %102 : vector<24x32xf32>
    %cst_89 = arith.constant 0.000000e+00 : f32
    %104 = vector.broadcast %cst_89 : f32 to vector<24x32xf32>
    %105 = arith.maximumf %103, %104 : vector<24x32xf32>
    %c7 = arith.constant 7 : index
    %c0_90 = arith.constant 0 : index
    %c0_91 = arith.constant 0 : index
    %106 = vector.load %arg7[%c7, %c0_90, %c0_91] : memref<8x32x32xf32, #tpu.memory_space<vmem>>, vector<1x32x32xf32>
    %107 = vector.shape_cast %106 : vector<1x32x32xf32> to vector<32x32xf32>
    %cst_92 = arith.constant dense<0.000000e+00> : vector<24x32xf32>
    %108 = tpu.matmul %105, %107, %cst_92 {dimension_numbers = #tpu.dot_dimension_numbers<[1], [0], [0], [1], [0, 0, 1, 1], [], []>} : vector<24x32xf32>, vector<32x32xf32>, vector<24x32xf32> -> vector<24x32xf32>
    %c7_93 = arith.constant 7 : index
    %c0_94 = arith.constant 0 : index
    %c0_95 = arith.constant 0 : index
    %109 = vector.load %arg8[%c7_93, %c0_94, %c0_95] : memref<8x1x32xf32, #tpu.memory_space<vmem>>, vector<1x1x32xf32>
    %110 = vector.shape_cast %109 : vector<1x1x32xf32> to vector<1x32xf32>
    %111 = vector.broadcast %110 : vector<1x32xf32> to vector<24x32xf32>
    %112 = arith.addf %108, %111 : vector<24x32xf32>
    %cst_96 = arith.constant 0.000000e+00 : f32
    %113 = vector.broadcast %cst_96 : f32 to vector<24x32xf32>
    %114 = arith.maximumf %112, %113 : vector<24x32xf32>
    %c0_97 = arith.constant 0 : index
    %c0_98 = arith.constant 0 : index
    %115 = vector.load %arg3[%c0_97, %c0_98] : memref<24x16xf32, #tpu.memory_space<vmem>>, vector<24x16xf32>
    %cst_99 = arith.constant dense<0.000000e+00> : vector<24x32xf32>
    %116 = tpu.matmul %115, %41, %cst_99 {dimension_numbers = #tpu.dot_dimension_numbers<[1], [0], [0], [1], [0, 0, 1, 1], [], []>} : vector<24x16xf32>, vector<16x32xf32>, vector<24x32xf32> -> vector<24x32xf32>
    %c0_100 = arith.constant 0 : index
    %c0_101 = arith.constant 0 : index
    %117 = vector.load %arg4[%c0_100, %c0_101] : memref<24x16xf32, #tpu.memory_space<vmem>>, vector<24x16xf32>
    %cst_102 = arith.constant dense<0.000000e+00> : vector<24x32xf32>
    %118 = tpu.matmul %117, %41, %cst_102 {dimension_numbers = #tpu.dot_dimension_numbers<[1], [0], [0], [1], [0, 0, 1, 1], [], []>} : vector<24x16xf32>, vector<16x32xf32>, vector<24x32xf32> -> vector<24x32xf32>
    %c0_103 = arith.constant 0 : index
    %c0_104 = arith.constant 0 : index
    %c0_105 = arith.constant 0 : index
    %119 = vector.load %arg9[%c0_103, %c0_104, %c0_105] : memref<3x32x32xf32, #tpu.memory_space<vmem>>, vector<1x32x32xf32>
    %120 = vector.shape_cast %119 : vector<1x32x32xf32> to vector<32x32xf32>
    %cst_106 = arith.constant dense<0.000000e+00> : vector<24x32xf32>
    %121 = tpu.matmul %116, %120, %cst_106 {dimension_numbers = #tpu.dot_dimension_numbers<[1], [0], [0], [1], [0, 0, 1, 1], [], []>} : vector<24x32xf32>, vector<32x32xf32>, vector<24x32xf32> -> vector<24x32xf32>
    %c1_107 = arith.constant 1 : index
    %c0_108 = arith.constant 0 : index
    %c0_109 = arith.constant 0 : index
    %122 = vector.load %arg9[%c1_107, %c0_108, %c0_109] : memref<3x32x32xf32, #tpu.memory_space<vmem>>, vector<1x32x32xf32>
    %123 = vector.shape_cast %122 : vector<1x32x32xf32> to vector<32x32xf32>
    %cst_110 = arith.constant dense<0.000000e+00> : vector<24x32xf32>
    %124 = tpu.matmul %118, %123, %cst_110 {dimension_numbers = #tpu.dot_dimension_numbers<[1], [0], [0], [1], [0, 0, 1, 1], [], []>} : vector<24x32xf32>, vector<32x32xf32>, vector<24x32xf32> -> vector<24x32xf32>
    %125 = arith.addf %121, %124 : vector<24x32xf32>
    %c2_111 = arith.constant 2 : index
    %c0_112 = arith.constant 0 : index
    %c0_113 = arith.constant 0 : index
    %126 = vector.load %arg9[%c2_111, %c0_112, %c0_113] : memref<3x32x32xf32, #tpu.memory_space<vmem>>, vector<1x32x32xf32>
    %127 = vector.shape_cast %126 : vector<1x32x32xf32> to vector<32x32xf32>
    %cst_114 = arith.constant dense<0.000000e+00> : vector<24x32xf32>
    %128 = tpu.matmul %114, %127, %cst_114 {dimension_numbers = #tpu.dot_dimension_numbers<[1], [0], [0], [1], [0, 0, 1, 1], [], []>} : vector<24x32xf32>, vector<32x32xf32>, vector<24x32xf32> -> vector<24x32xf32>
    %129 = arith.addf %125, %128 : vector<24x32xf32>
    %c0_115 = arith.constant 0 : index
    %c0_116 = arith.constant 0 : index
    %130 = vector.load %arg10[%c0_115, %c0_116] : memref<1x32xf32, #tpu.memory_space<vmem>>, vector<1x32xf32>
    %131 = vector.broadcast %130 : vector<1x32xf32> to vector<24x32xf32>
    %132 = arith.addf %129, %131 : vector<24x32xf32>
    %cst_117 = arith.constant 0.000000e+00 : f32
    %133 = vector.broadcast %cst_117 : f32 to vector<24x32xf32>
    %134 = arith.maximumf %132, %133 : vector<24x32xf32>
    %c0_118 = arith.constant 0 : index
    %c0_119 = arith.constant 0 : index
    %c0_120 = arith.constant 0 : index
    %135 = vector.load %arg11[%c0_118, %c0_119, %c0_120] : memref<3x32x32xf32, #tpu.memory_space<vmem>>, vector<1x32x32xf32>
    %136 = vector.shape_cast %135 : vector<1x32x32xf32> to vector<32x32xf32>
    %cst_121 = arith.constant dense<0.000000e+00> : vector<24x32xf32>
    %137 = tpu.matmul %134, %136, %cst_121 {dimension_numbers = #tpu.dot_dimension_numbers<[1], [0], [0], [1], [0, 0, 1, 1], [], []>} : vector<24x32xf32>, vector<32x32xf32>, vector<24x32xf32> -> vector<24x32xf32>
    %c0_122 = arith.constant 0 : index
    %c0_123 = arith.constant 0 : index
    %c0_124 = arith.constant 0 : index
    %138 = vector.load %arg12[%c0_122, %c0_123, %c0_124] : memref<3x1x32xf32, #tpu.memory_space<vmem>>, vector<1x1x32xf32>
    %139 = vector.shape_cast %138 : vector<1x1x32xf32> to vector<1x32xf32>
    %140 = vector.broadcast %139 : vector<1x32xf32> to vector<24x32xf32>
    %141 = arith.addf %137, %140 : vector<24x32xf32>
    %cst_125 = arith.constant 0.000000e+00 : f32
    %142 = vector.broadcast %cst_125 : f32 to vector<24x32xf32>
    %143 = arith.maximumf %141, %142 : vector<24x32xf32>
    %c1_126 = arith.constant 1 : index
    %c0_127 = arith.constant 0 : index
    %c0_128 = arith.constant 0 : index
    %144 = vector.load %arg11[%c1_126, %c0_127, %c0_128] : memref<3x32x32xf32, #tpu.memory_space<vmem>>, vector<1x32x32xf32>
    %145 = vector.shape_cast %144 : vector<1x32x32xf32> to vector<32x32xf32>
    %cst_129 = arith.constant dense<0.000000e+00> : vector<24x32xf32>
    %146 = tpu.matmul %143, %145, %cst_129 {dimension_numbers = #tpu.dot_dimension_numbers<[1], [0], [0], [1], [0, 0, 1, 1], [], []>} : vector<24x32xf32>, vector<32x32xf32>, vector<24x32xf32> -> vector<24x32xf32>
    %c1_130 = arith.constant 1 : index
    %c0_131 = arith.constant 0 : index
    %c0_132 = arith.constant 0 : index
    %147 = vector.load %arg12[%c1_130, %c0_131, %c0_132] : memref<3x1x32xf32, #tpu.memory_space<vmem>>, vector<1x1x32xf32>
    %148 = vector.shape_cast %147 : vector<1x1x32xf32> to vector<1x32xf32>
    %149 = vector.broadcast %148 : vector<1x32xf32> to vector<24x32xf32>
    %150 = arith.addf %146, %149 : vector<24x32xf32>
    %cst_133 = arith.constant 0.000000e+00 : f32
    %151 = vector.broadcast %cst_133 : f32 to vector<24x32xf32>
    %152 = arith.maximumf %150, %151 : vector<24x32xf32>
    %c2_134 = arith.constant 2 : index
    %c0_135 = arith.constant 0 : index
    %c0_136 = arith.constant 0 : index
    %153 = vector.load %arg11[%c2_134, %c0_135, %c0_136] : memref<3x32x32xf32, #tpu.memory_space<vmem>>, vector<1x32x32xf32>
    %154 = vector.shape_cast %153 : vector<1x32x32xf32> to vector<32x32xf32>
    %cst_137 = arith.constant dense<0.000000e+00> : vector<24x32xf32>
    %155 = tpu.matmul %152, %154, %cst_137 {dimension_numbers = #tpu.dot_dimension_numbers<[1], [0], [0], [1], [0, 0, 1, 1], [], []>} : vector<24x32xf32>, vector<32x32xf32>, vector<24x32xf32> -> vector<24x32xf32>
    %c2_138 = arith.constant 2 : index
    %c0_139 = arith.constant 0 : index
    %c0_140 = arith.constant 0 : index
    %156 = vector.load %arg12[%c2_138, %c0_139, %c0_140] : memref<3x1x32xf32, #tpu.memory_space<vmem>>, vector<1x1x32xf32>
    %157 = vector.shape_cast %156 : vector<1x1x32xf32> to vector<1x32xf32>
    %158 = vector.broadcast %157 : vector<1x32xf32> to vector<24x32xf32>
    %159 = arith.addf %155, %158 : vector<24x32xf32>
    %cst_141 = arith.constant 0.000000e+00 : f32
    %160 = vector.broadcast %cst_141 : f32 to vector<24x32xf32>
    %161 = arith.maximumf %159, %160 : vector<24x32xf32>
    %c0_142 = arith.constant 0 : index
    %c0_143 = arith.constant 0 : index
    %162 = vector.load %arg13[%c0_142, %c0_143] : memref<32x128xf32, #tpu.memory_space<vmem>>, vector<32x128xf32>
    %cst_144 = arith.constant dense<0.000000e+00> : vector<24x128xf32>
    %163 = tpu.matmul %161, %162, %cst_144 {dimension_numbers = #tpu.dot_dimension_numbers<[1], [0], [0], [1], [0, 0, 1, 1], [], []>} : vector<24x32xf32>, vector<32x128xf32>, vector<24x128xf32> -> vector<24x128xf32>
    %c0_145 = arith.constant 0 : index
    %c0_146 = arith.constant 0 : index
    %164 = vector.load %arg14[%c0_145, %c0_146] : memref<1x128xf32, #tpu.memory_space<vmem>>, vector<1x128xf32>
    %165 = vector.broadcast %164 : vector<1x128xf32> to vector<24x128xf32>
    %166 = arith.addf %163, %165 : vector<24x128xf32>
    %c0_147 = arith.constant 0 : index
    %c0_148 = arith.constant 0 : index
    %167 = vector.load %arg15[%c0_147, %c0_148] : memref<24x128xf32, #tpu.memory_space<vmem>>, vector<24x128xf32>
    tpu.vector_store %arg15[%c0_147, %c0_148], %166 {strides = array<i32>} : memref<24x128xf32, #tpu.memory_space<vmem>>, vector<24x128xf32>,
    return
  }
}

</mosaic_0001>

<bundles_post_ra>
// kernel: tpu_custom_call.1
= control target key start
LH: loop header
LB: loop body
LE: loop exit
PB: predicated region body
PF: predicated region fallthrough
CT: control target
= control target key end

     0   :  { %20 = vsyncpa [#allocation3], 0  ;;  %s4170_s0 = inlined_call_operand.hbm [shape: f32[16,16], index: 0, kind: input, shape index: {}]   ;;  %s4171_s1 = inlined_call_operand.hbm [shape: f32[16,32], index: 1, kind: input, shape index: {}]   ;;  %s4172_s2 = inlined_call_operand.hbm [shape: f32[24,32], index: 2, kind: input, shape index: {}]   ;;  %s4173_s3 = inlined_call_operand.vmem [shape: f32[24,16], index: 3, kind: input, shape index: {}]   ;;  %s4174_s4 = inlined_call_operand.vmem [shape: f32[24,16], index: 4, kind: input, shape index: {}]   ;;  %s4175_s5 = inlined_call_operand.hbm [shape: f32[4,32,32], index: 5, kind: input, shape index: {}]   ;;  %s4176_s6 = inlined_call_operand.hbm [shape: f32[4,1,32], index: 6, kind: input, shape index: {}]   ;;  %s4177_s7 = inlined_call_operand.hbm [shape: f32[8,32,32], index: 7, kind: input, shape index: {}]   ;;  %s4178_s8 = inlined_call_operand.hbm [shape: f32[8,1,32], index: 8, kind: input, shape index: {}]   ;;  %s4179_s9 = inlined_call_operand.vmem [shape: f32[3,32,32], index: 9, kind: input, shape index: {}]   ;;  %s4180_s10 = inlined_call_operand.vmem [shape: f32[1,32], index: 10, kind: input, shape index: {}]   ;;  %s4181_s11 = inlined_call_operand.hbm [shape: f32[3,32,32], index: 11, kind: input, shape index: {}]   ;;  %s4182_s12 = inlined_call_operand.hbm [shape: f32[3,1,32], index: 12, kind: input, shape index: {}]   ;;  %s4183_s13 = inlined_call_operand.vmem [shape: f32[32,128], index: 13, kind: input, shape index: {}]   ;;  %s4184_s14 = inlined_call_operand.vmem [shape: f32[1,128], index: 14, kind: input, shape index: {}]   ;;  %s4185_s15 = inlined_call_operand.hbm [shape: f32[24,128], index: 15, kind: output, shape index: {}]  }
   0x1   :  { %21 = vsyncpa [#allocation6], 0 }
   0x2   :  { %22 = vsyncpa [#allocation9], 0 }
   0x3   :  { %23 = vsyncpa [#allocation12], 0 }
   0x4   :  { %24 = vsyncpa [#allocation15], 0 }
   0x5   :  { %25 = vsyncpa [#allocation4], 0  ;;  %s3619_s18 = smov [#allocation5]   ;;  %s3620_s20 = smov [#allocation8]  }
   0x6   :  { %s43_s19 = sshll.u32 %s3619_s18, 4  ;;  %s71_s21 = sshll.u32 %s3620_s20, 4  ;;  %s44_s19 = int_to_ptr.vmem [resolvable:$true] %s43_s19  ;;  %s3716_s21 = int_to_ptr.vmem [resolvable:$true] %s71_s21 }
   0x7   :  { %s3387_s24 = scalar_lea.hbm %s4171_s1, 256 }
   0x8   :  { %p3388_p0 = scmp.ne.s32.totalorder %s4171_s1, %s3387_s24  ;;  %p3391_p1 = scmp.lt.u32.totalorder %s3387_s24, %s4171_s1 }
   0xa   :  { %p3393_p2 = pnand %p3391_p1, %p3388_p0 }
   0xc   :  { %3396 = shalt.err (!%p3393_p2)
}
   0xd   :  { %s3397_s29 = scalar_lea.vmem %s44_s19, 256  ;;  %p3402_p4 = scmp.lt.s32.totalorder %s44_s19, %s44_s19 }
   0xe   :  { %p3398_p3 = scmp.ne.s32.totalorder %s44_s19, %s3397_s29  ;;  %p3403_p5 = scmp.lt.s32.totalorder %s3397_s29, %s3397_s29 }
  0x10   :  { %p3404_p6 = por %p3403_p5, %p3402_p4 }
  0x12   :  { %p3405_p7 = pnand %p3404_p6, %p3398_p3 }
  0x14   :  { %3408 = shalt.err (!%p3405_p7)
}
  0x15   :  { %s3621_s30 = smov 128   ;;  %s3622_s16 = smov 8  }
  0x16   :  { %49 = dma.hbm_to_vmem [thread:$0]  %s4171_s1, 256, %s44_s19, [#allocation6], %s3621_s30, %s3621_s30, %s3622_s16  }
  0x17   :  { %s3409_s23 = scalar_lea.hbm %s4175_s5, 2048 }
  0x18   :  { %p3410_p8 = scmp.ne.s32.totalorder %s4175_s5, %s3409_s23  ;;  %p3413_p9 = scmp.lt.u32.totalorder %s3409_s23, %s4175_s5 }
  0x1a   :  { %p3415_p10 = pnand %p3413_p9, %p3410_p8 }
  0x1c   :  { %3418 = shalt.err (!%p3415_p10)
}
  0x1d   :  { %s3419_s28 = scalar_lea.vmem %s3716_s21, 2048  ;;  %p3424_p12 = scmp.lt.s32.totalorder %s3716_s21, %s3716_s21 }
  0x1e   :  { %p3420_p11 = scmp.ne.s32.totalorder %s3716_s21, %s3419_s28  ;;  %p3425_p13 = scmp.lt.s32.totalorder %s3419_s28, %s3419_s28 }
  0x20   :  { %p3426_p0 = por %p3425_p13, %p3424_p12 }
  0x22   :  { %p3427_p1 = pnand %p3426_p0, %p3420_p11 }
  0x24   :  { %3430 = shalt.err (!%p3427_p1)
}
  0x25   :  { %77 = dma.hbm_to_vmem [thread:$0]  %s4175_s5, 2048, %s3716_s21, [#allocation9], %s3621_s30, %s3621_s30, %s3622_s16  }
  0x26   :  { %s3623_s29 = smov [#allocation11]   ;;  %s3624_s18 = smov [#allocation14]  }
  0x27   :  { %s95_s17 = sshll.u32 %s3623_s29, 4  ;;  %s123_s20 = sshll.u32 %s3624_s18, 4  ;;  %s96_s17 = int_to_ptr.vmem [resolvable:$true] %s95_s17  ;;  %s3753_s20 = int_to_ptr.vmem [resolvable:$true] %s123_s20 }
  0x28   :  { %s3431_s24 = scalar_lea.hbm %s4177_s7, 4096 }
  0x29   :  { %p3432_p2 = scmp.ne.s32.totalorder %s4177_s7, %s3431_s24  ;;  %p3435_p3 = scmp.lt.u32.totalorder %s3431_s24, %s4177_s7 }
  0x2b   :  { %p3437_p4 = pnand %p3435_p3, %p3432_p2 }
  0x2d   :  { %3440 = shalt.err (!%p3437_p4)
}
  0x2e   :  { %s3441_s5 = scalar_lea.vmem %s96_s17, 4096  ;;  %p3446_p6 = scmp.lt.s32.totalorder %s96_s17, %s96_s17 }
  0x2f   :  { %p3442_p5 = scmp.ne.s32.totalorder %s96_s17, %s3441_s5  ;;  %p3447_p7 = scmp.lt.s32.totalorder %s3441_s5, %s3441_s5 }
  0x31   :  { %p3448_p8 = por %p3447_p7, %p3446_p6 }
  0x33   :  { %p3449_p9 = pnand %p3448_p8, %p3442_p5 }
  0x35   :  { %3452 = shalt.err (!%p3449_p9)
}
  0x36   :  { %101 = dma.hbm_to_vmem [thread:$0]  %s4177_s7, 4096, %s96_s17, [#allocation12], %s3621_s30, %s3621_s30, %s3622_s16  }
  0x37   :  { %s3453_s18 = scalar_lea.hbm %s4181_s11, 1536 }
  0x38   :  { %p3454_p10 = scmp.ne.s32.totalorder %s4181_s11, %s3453_s18  ;;  %p3457_p11 = scmp.lt.u32.totalorder %s3453_s18, %s4181_s11 }
  0x3a   :  { %p3459_p12 = pnand %p3457_p11, %p3454_p10 }
  0x3c   :  { %3462 = shalt.err (!%p3459_p12)
}
  0x3d   :  { %s3463_s26 = scalar_lea.vmem %s3753_s20, 1536  ;;  %p3468_p0 = scmp.lt.s32.totalorder %s3753_s20, %s3753_s20 }
  0x3e   :  { %p3464_p13 = scmp.ne.s32.totalorder %s3753_s20, %s3463_s26  ;;  %p3469_p1 = scmp.lt.s32.totalorder %s3463_s26, %s3463_s26 }
  0x40   :  { %p3470_p2 = por %p3469_p1, %p3468_p0 }
  0x42   :  { %p3471_p3 = pnand %p3470_p2, %p3464_p13 }
  0x44   :  { %3474 = shalt.err (!%p3471_p3)
}
  0x45   :  { %129 = dma.hbm_to_vmem [thread:$0]  %s4181_s11, 1536, %s3753_s20, [#allocation15], %s3621_s30, %s3621_s30, %s3622_s16  }
  0x46   :  { %s3625_s27 = smov [#allocation2]   ;;  %s3626_s5 = smov [#allocation7]  }
  0x47   :  { %s31_s28 = sshll.u32 %s3625_s27, 4  ;;  %s55_s21 = sshll.u32 %s3626_s5, 4  ;;  %s32_s28 = int_to_ptr.vmem [resolvable:$true] %s31_s28  ;;  %s3790_s21 = int_to_ptr.vmem [resolvable:$true] %s55_s21 }
  0x48   :  { %s3475_s29 = scalar_lea.hbm %s4170_s0, 256 }
  0x49   :  { %p3476_p4 = scmp.ne.s32.totalorder %s4170_s0, %s3475_s29  ;;  %p3479_p5 = scmp.lt.u32.totalorder %s3475_s29, %s4170_s0 }
  0x4b   :  { %p3481_p6 = pnand %p3479_p5, %p3476_p4 }
  0x4d   :  { %3484 = shalt.err (!%p3481_p6)
}
  0x4e   :  { %s3485_s11 = scalar_lea.vmem %s32_s28, 256  ;;  %p3490_p8 = scmp.lt.s32.totalorder %s32_s28, %s32_s28 }
  0x4f   :  { %p3486_p7 = scmp.ne.s32.totalorder %s32_s28, %s3485_s11  ;;  %p3491_p9 = scmp.lt.s32.totalorder %s3485_s11, %s3485_s11 }
  0x51   :  { %p3492_p10 = por %p3491_p9, %p3490_p8 }
  0x53   :  { %p3493_p11 = pnand %p3492_p10, %p3486_p7 }
  0x55   :  { %3496 = shalt.err (!%p3493_p11)
}
  0x56   :  { %37 = dma.hbm_to_vmem [thread:$0]  %s4170_s0, 256, %s32_s28, [#allocation3], %s3621_s30, %s3621_s30, %s3622_s16  }
  0x57   :  { %s3497_s17 = scalar_lea.hbm %s4172_s2, 384 }
  0x58   :  { %p3498_p12 = scmp.ne.s32.totalorder %s4172_s2, %s3497_s17  ;;  %p3501_p13 = scmp.lt.u32.totalorder %s3497_s17, %s4172_s2 }
  0x5a   :  { %p3503_p0 = pnand %p3501_p13, %p3498_p12 }
  0x5c   :  { %3506 = shalt.err (!%p3503_p0)
}
  0x5d   :  { %s3507_s29 = scalar_lea.vmem %s3790_s21, 384  ;;  %p3512_p2 = scmp.lt.s32.totalorder %s3790_s21, %s3790_s21 }
  0x5e   :  { %p3508_p1 = scmp.ne.s32.totalorder %s3790_s21, %s3507_s29  ;;  %p3513_p3 = scmp.lt.s32.totalorder %s3507_s29, %s3507_s29 }
  0x60   :  { %p3514_p4 = por %p3513_p3, %p3512_p2 }
  0x62   :  { %p3515_p5 = pnand %p3514_p4, %p3508_p1 }
  0x64   :  { %3518 = shalt.err (!%p3515_p5)
}
  0x65   :  { %61 = dma.hbm_to_vmem [thread:$0]  %s4172_s2, 384, %s3790_s21, [#allocation6], %s3621_s30, %s3621_s30, %s3622_s16  }
  0x66   :  { %s3627_s18 = smov [#allocation10]   ;;  %s3519_s11 = scalar_lea.hbm %s4176_s6, 64 }
  0x67   :  { %s83_s22 = sshll.u32 %s3627_s18, 4  ;;  %p3520_p6 = scmp.ne.s32.totalorder %s4176_s6, %s3519_s11  ;;  %s84_s22 = int_to_ptr.vmem [resolvable:$true] %s83_s22 }
  0x68   :  { %p3523_p7 = scmp.lt.u32.totalorder %s3519_s11, %s4176_s6 }
  0x6a   :  { %p3525_p8 = pnand %p3523_p7, %p3520_p6 }
  0x6c   :  { %3528 = shalt.err (!%p3525_p8)
}
  0x6d   :  { %s3529_s17 = scalar_lea.vmem %s84_s22, 64  ;;  %p3534_p10 = scmp.lt.s32.totalorder %s84_s22, %s84_s22 }
  0x6e   :  { %p3530_p9 = scmp.ne.s32.totalorder %s84_s22, %s3529_s17  ;;  %p3535_p11 = scmp.lt.s32.totalorder %s3529_s17, %s3529_s17 }
  0x70   :  { %p3536_p12 = por %p3535_p11, %p3534_p10 }
  0x72   :  { %p3537_p13 = pnand %p3536_p12, %p3530_p9 }
  0x74   :  { %3540 = shalt.err (!%p3537_p13)
}
  0x75   :  { %s3628_s2 = smov 16   ;;  %s3629_s21 = smov 1  }
  0x76   :  { %89 = dma.hbm_to_vmem [thread:$0]  %s4176_s6, 64, %s84_s22, [#allocation9], %s3628_s2, %s3628_s2, %s3629_s21  }
  0x77   :  { %s3630_s1 = smov [#allocation13]   ;;  %s3631_s29 = smov [#allocation16]  }
  0x78   :  { %s107_s19 = sshll.u32 %s3630_s1, 4  ;;  %s135_s0 = sshll.u32 %s3631_s29, 4  ;;  %s108_s19 = int_to_ptr.vmem [resolvable:$true] %s107_s19  ;;  %s136_s0 = int_to_ptr.vmem [resolvable:$true] %s135_s0 }
  0x79   :  { %s3541_s23 = scalar_lea.hbm %s4178_s8, 128 }
  0x7a   :  { %p3542_p0 = scmp.ne.s32.totalorder %s4178_s8, %s3541_s23  ;;  %p3545_p1 = scmp.lt.u32.totalorder %s3541_s23, %s4178_s8 }
  0x7c   :  { %p3547_p2 = pnand %p3545_p1, %p3542_p0 }
  0x7e   :  { %3550 = shalt.err (!%p3547_p2)
}
  0x7f   :  { %s3551_s6 = scalar_lea.vmem %s108_s19, 128  ;;  %p3556_p4 = scmp.lt.s32.totalorder %s108_s19, %s108_s19 }
  0x80   :  { %p3552_p3 = scmp.ne.s32.totalorder %s108_s19, %s3551_s6  ;;  %p3557_p5 = scmp.lt.s32.totalorder %s3551_s6, %s3551_s6 }
  0x82   :  { %p3558_p6 = por %p3557_p5, %p3556_p4 }
  0x84   :  { %p3559_p7 = pnand %p3558_p6, %p3552_p3 }
  0x86   :  { %3562 = shalt.err (!%p3559_p7)
}
  0x87   :  { %113 = dma.hbm_to_vmem [thread:$0]  %s4178_s8, 128, %s108_s19, [#allocation12], %s3628_s2, %s3628_s2, %s3629_s21  }
  0x88   :  { %s3563_s27 = scalar_lea.hbm %s4182_s12, 48 }
  0x89   :  { %p3564_p8 = scmp.ne.s32.totalorder %s4182_s12, %s3563_s27  ;;  %p3567_p9 = scmp.lt.u32.totalorder %s3563_s27, %s4182_s12 }
  0x8b   :  { %p3569_p10 = pnand %p3567_p9, %p3564_p8 }
  0x8d   :  { %3572 = shalt.err (!%p3569_p10)
}
  0x8e   :  { %s3573_s18 = scalar_lea.vmem %s136_s0, 48  ;;  %s3577_s23 = scalar_lea.vmem %s136_s0, 64 }
  0x8f   :  { %p3574_p11 = scmp.ne.s32.totalorder %s136_s0, %s3573_s18  ;;  %p3578_p12 = scmp.lt.s32.totalorder %s136_s0, %s136_s0 }
  0x90   :  { %p3579_p13 = scmp.lt.s32.totalorder %s3577_s23, %s3573_s18 }
  0x92   :  { %p3580_p0 = por %p3579_p13, %p3578_p12 }
  0x94   :  { %p3581_p1 = pnand %p3580_p0, %p3574_p11 }
  0x96   :  { %3584 = shalt.err (!%p3581_p1)
}
  0x97   :  { %141 = dma.hbm_to_vmem [thread:$0]  %s4182_s12, 48, %s136_s0, [#allocation15], %s3628_s2, %s3628_s2, %s3629_s21  }
  0x98   :  { %3607 = dma.done.wait [#allocation3], 256  }
  0x99   :  { %3608 = vsyncadd [#allocation3], 4294967040 }
  0x9a   :  { %3609 = dma.done.wait [#allocation6], 640  }
  0x9b   :  { %3610 = vsyncadd [#allocation6], 4294966656 }
  0x9c   :  { %3611 = dma.done.wait [#allocation9], 2112  }
  0x9d   :  { %3612 = vsyncadd [#allocation9], 4294965184 }
  0x9e   :  { %3613 = dma.done.wait [#allocation12], 4224  }
  0x9f   :  { %3614 = vsyncadd [#allocation12], 4294963072 }
  0xa0   :  { %3615 = dma.done.wait [#allocation15], 1584  }
  0xa1   :  { %3616 = vsyncadd [#allocation15], 4294965712  ;;  %vm181_vm0 = vcmask 261120   ;;  %v177_v0 = vld [vmem:[#allocation8] sm:$0xff]  ;;  %v178_v1 = vld [vmem:[#allocation8 + $0x8] sm:$0xff]  ;;  %vm270_vm1 = vcmask 130048  }
  0xa2   :  { %v179_v2 = vld [vmem:[#allocation8 + $0x10] sm:$0xff]  ;;  %v3226_v3 = vpack.c.bf16 %v178_v1, %v177_v0  ;;  %v180_v4 = vld [vmem:[#allocation8 + $0x18] sm:$0xff]  ;;  %v176_v7 = vld [vmem:[#allocation5 + $0x8] sm:$0xff]  ;;  %v3632_v58 = vmov 0.0|0.0   ;;  %vm3633_vm2 = vmmov 0   ;;  %v3634_v59 = vmov 0.0  }
  0xa3   :  { %v175_v5 = vld [vmem:[#allocation5] sm:$0xff]  ;;  %v3230_v6 = vpack.c.bf16 %v180_v4, %v179_v2  ;;  %v173_v8 = vld [vmem:[#allocation2] sm:$0xff]  ;;  %v355_v9 = vld [vmem:[#allocation8 + $0x20] sm:$0xff]  ;;  %s3635_s23 = smov [#allocation17]  }
  0xa4   :  { %2881 = vmatprep.mubr.msk.f32.mxu1 %vm181_vm0, %v175_v5  ;;  %3227 = vmatprep.subr.bf16.mxu1 %v3226_v3  ;;  %v356_v10 = vld [vmem:[#allocation8 + $0x28] sm:$0xff]  ;;  %v3876_v15 = vld [vmem:[#allocation2 + $0x8] sm:$0xff]  ;;  %v358_v17 = vld [vmem:[#allocation8 + $0x38] sm:$0xff]  ;;  %s2610_s8 = sshll.u32 %s3635_s23, 4  ;;  %s2611_s8 = int_to_ptr.vmem [resolvable:$true] %s2610_s8 }
  0xa5   :  { %3229 = vmatpush3.bf16.msra.mxu1 %v3226_v3  ;;  %2906 = vmatprep.mubr.msk.f32.mxu0 %vm270_vm1, %v173_v8  ;;  %v3238_v14 = vpack.c.bf16 %v356_v10, %v355_v9  ;;  %v357_v16 = vld [vmem:[#allocation8 + $0x30] sm:$0xff]  ;;  %v2628_v19 = vld [vmem:[#allocation10] ss:$0 sm:$0xff]  ;;  %v527_v27 = vld [vmem:[#allocation8 + $0x48] sm:$0xff]  ;;  %s3585_s19 = scalar_lea.vmem %s2611_s8, 384  ;;  %p3590_p3 = scmp.lt.s32.totalorder %s2611_s8, %s2611_s8 }
  0xa6   :  { %3231 = vmatprep.subr.bf16.mxu1 %v3230_v6  ;;  %v3242_v18 = vpack.c.bf16 %v358_v17, %v357_v16  ;;  %v526_v26 = vld [vmem:[#allocation8 + $0x40] sm:$0xff]  ;;  %v528_v32 = vld [vmem:[#allocation8 + $0x50] sm:$0xff]  ;;  %v529_v33 = vld [vmem:[#allocation8 + $0x58] sm:$0xff]  ;;  %p3586_p2 = scmp.ne.s32.totalorder %s2611_s8, %s3585_s19  ;;  %p3591_p4 = scmp.lt.s32.totalorder %s3585_s19, %s3585_s19 }
  0xa7   :  { %v3250_v31 = vpack.c.bf16 %v527_v27, %v526_v26  ;;  %v3254_v34 = vpack.c.bf16 %v529_v33, %v528_v32  ;;  %v2633_v35 = vld [vmem:[#allocation10 + $0x1] ss:$0 sm:$0xff]  ;;  %v698_v43 = vld [vmem:[#allocation8 + $0x68] sm:$0xff]  ;;  %v699_v48 = vld [vmem:[#allocation8 + $0x70] sm:$0xff] }
  0xa8   :  { %v697_v42 = vld [vmem:[#allocation8 + $0x60] sm:$0xff]  ;;  %v700_v49 = vld [vmem:[#allocation8 + $0x78] sm:$0xff]  ;;  %v871_v0 = vld [vmem:[#allocation11 + $0x8] sm:$0xff]  ;;  %p3592_p5 = por %p3591_p4, %p3590_p3 }
  0xa9   :  { %3233 = vmatpush3.bf16.msra.mxu1 %v3230_v6  ;;  %v3262_v47 = vpack.c.bf16 %v698_v43, %v697_v42  ;;  %v3266_v50 = vpack.c.bf16 %v700_v49, %v699_v48  ;;  %v2638_v51 = vld [vmem:[#allocation10 + $0x2] ss:$0 sm:$0xff]  ;;  %v870_v63 = vld [vmem:[#allocation11] sm:$0xff]  ;;  %v872_v2 = vld [vmem:[#allocation11 + $0x10] sm:$0xff] }
  0xaa   :  { %v3275_v1 = vpack.c.bf16 %v871_v0, %v870_v63  ;;  %v873_v3 = vld [vmem:[#allocation11 + $0x18] sm:$0xff]  ;;  %v867_v5 = vld [vmem:[#allocation7] sm:$0xff]  ;;  %v868_v6 = vld [vmem:[#allocation7 + $0x8] sm:$0xff]  ;;  %p3593_p6 = pnand %p3592_p5, %p3586_p2 }
  0xab   :  { %v3278_v4 = vpack.c.bf16 %v873_v3, %v872_v2  ;;  %v975_v9 = vld [vmem:[#allocation11 + $0x28] sm:$0xff]  ;;  %v2643_v17 = vld [vmem:[#allocation10 + $0x3] ss:$0 sm:$0xff] }
  0xac   :  { %2882 = vmatmul.mubr.msk.f32.vlgmr.msra.gmra.mrb[0].mxu1 %vm181_vm0, %v176_v7  ;;  %v869_v7 = vld [vmem:[#allocation7 + $0x10] sm:$0xff]  ;;  %v1185_v42 = vld [vmem:[#allocation11 + $0x68] sm:$0xff] }
  0xad   :  { %2888 = vmatprep.mubr.msk.f32.mxu1 %vm270_vm1, %v173_v8  ;;  %v1290_v63 = vld [vmem:[#allocation11 + $0x88] sm:$0xff] }
 0x17f   :  { %v2883_v11 = vpop.f32.mrb[0].mxu1 }
 0x180   :  { %v254_v12 = vpop.f32.mrb[1].mxu1 }
 0x181   :  { %v3234_v13 = vpack.c.bf16 %v2883_v11, %v254_v12  ;;  %v976_v11 = vld [vmem:[#allocation11 + $0x30] sm:$0xff]  ;;  %v977_v12 = vld [vmem:[#allocation11 + $0x38] sm:$0xff] }
 0x183   :  { %3235 = vmatprep.subr.bf16.mxu1 %v3234_v13 }
 0x184   :  { %3237 = vmatpush3.bf16.msra.mxu1 %v3234_v13  ;;  %v3284_v13 = vpack.c.bf16 %v977_v12, %v976_v11 }
 0x185   :  { %3239 = vmatprep.subr.bf16.mxu1 %v3238_v14 }
 0x187   :  { %2889 = vmatmul.mubr.msk.f32.vlgmr.msra.gmra.mrb[2].mxu1 %vm270_vm1, %v3876_v15 }
 0x188   :  { %3241 = vmatpush3.bf16.msra.mxu1 %v3238_v14  ;;  %v1079_v14 = vld [vmem:[#allocation11 + $0x40] sm:$0xff] }
 0x189   :  { %3243 = vmatprep.subr.bf16.mxu1 %v3242_v18 }
 0x18c   :  { %3245 = vmatpush3.bf16.msra.mxu1 %v3242_v18 }
 0x25a   :  { %v2890_v20 = vpop.f32.mrb[2].mxu1 }
 0x25b   :  { %v349_v21 = vadd.f32 %v2890_v20, %v2628_v19  ;;  %v343_v22 = vpop.f32.mrb[3].mxu1 }
 0x25c   :  { %v344_v23 = vadd.f32 %v2628_v19, %v343_v22 }
 0x25d   :  { %v353_v25 = vmax.f32 %v349_v21, 0.0 }
 0x25e   :  { %v352_v24 = vmax.f32 %v344_v23, 0.0 }
 0x260   :  { %2899 = vmatprep.mubr.msk.f32.mxu1 %vm181_vm0, %v352_v24 }
 0x261   :  { %2900 = vmatmul.mubr.msk.f32.vlgmr.msra.gmra.mrb[4].mxu1 %vm181_vm0, %v353_v25  ;;  %v2646_v25 = vld [vmem:[#allocation13] ss:$0 sm:$0xff] }
 0x262   :  { %2924 = vmatprep.mubr.msk.f32.mxu1 %vm270_vm1, %v173_v8 }
 0x334   :  { %v2901_v28 = vpop.f32.mrb[4].mxu1 }
 0x335   :  { %v431_v29 = vpop.f32.mrb[5].mxu1 }
 0x336   :  { %v3246_v30 = vpack.c.bf16 %v2901_v28, %v431_v29 }
 0x338   :  { %3247 = vmatprep.subr.bf16.mxu0 %v3246_v30 }
 0x339   :  { %3249 = vmatpush3.bf16.msra.mxu0 %v3246_v30 }
 0x33a   :  { %3251 = vmatprep.subr.bf16.mxu0 %v3250_v31 }
 0x33c   :  { %2907 = vmatmul.mubr.msk.f32.vlgmr.msra.gmra.mrb[0].mxu0 %vm270_vm1, %v3876_v15 }
 0x33d   :  { %3253 = vmatpush3.bf16.msra.mxu0 %v3250_v31 }
 0x33e   :  { %3255 = vmatprep.subr.bf16.mxu0 %v3254_v34 }
 0x341   :  { %3257 = vmatpush3.bf16.msra.mxu0 %v3254_v34 }
 0x40f   :  { %v2908_v36 = vpop.f32.mrb[0].mxu0 }
 0x410   :  { %v520_v37 = vadd.f32 %v2908_v36, %v2633_v35  ;;  %v514_v38 = vpop.f32.mrb[1].mxu0 }
 0x411   :  { %v515_v39 = vadd.f32 %v2633_v35, %v514_v38  ;;  %v1081_v38 = vld [vmem:[#allocation11 + $0x50] sm:$0xff] }
 0x412   :  { %v524_v41 = vmax.f32 %v520_v37, 0.0 }
 0x413   :  { %v523_v40 = vmax.f32 %v515_v39, 0.0  ;;  %v1082_v39 = vld [vmem:[#allocation11 + $0x58] sm:$0xff] }
 0x415   :  { %2917 = vmatprep.mubr.msk.f32.mxu0 %vm181_vm0, %v523_v40  ;;  %v3290_v40 = vpack.c.bf16 %v1082_v39, %v1081_v38  ;;  %v1500_v38 = vld [vmem:[#allocation11 + $0xc8] sm:$0xff] }
 0x416   :  { %2918 = vmatmul.mubr.msk.f32.vlgmr.msra.gmra.mrb[2].mxu0 %vm181_vm0, %v524_v41  ;;  %v1184_v41 = vld [vmem:[#allocation11 + $0x60] sm:$0xff] }
 0x417   :  { %2942 = vmatprep.mubr.msk.f32.mxu0 %vm270_vm1, %v173_v8  ;;  %v974_v8 = vld [vmem:[#allocation11 + $0x20] sm:$0xff]  ;;  %v3293_v43 = vpack.c.bf16 %v1185_v42, %v1184_v41 }
 0x418   :  { %v3281_v10 = vpack.c.bf16 %v975_v9, %v974_v8 }
 0x4e9   :  { %v2919_v44 = vpop.f32.mrb[2].mxu0 }
 0x4ea   :  { %v602_v45 = vpop.f32.mrb[3].mxu0 }
 0x4eb   :  { %v3258_v46 = vpack.c.bf16 %v2919_v44, %v602_v45  ;;  %v2650_v44 = vld [vmem:[#allocation13 + $0x1] ss:$0 sm:$0xff] }
 0x4ed   :  { %3259 = vmatprep.subr.bf16.mxu1 %v3258_v46 }
 0x4ee   :  { %3261 = vmatpush3.bf16.msra.mxu1 %v3258_v46 }
 0x4ef   :  { %3263 = vmatprep.subr.bf16.mxu1 %v3262_v47 }
 0x4f1   :  { %2925 = vmatmul.mubr.msk.f32.vlgmr.msra.gmra.mrb[6].mxu1 %vm270_vm1, %v3876_v15 }
 0x4f2   :  { %3265 = vmatpush3.bf16.msra.mxu1 %v3262_v47 }
 0x4f3   :  { %3267 = vmatprep.subr.bf16.mxu1 %v3266_v50 }
 0x4f6   :  { %3269 = vmatpush3.bf16.msra.mxu1 %v3266_v50 }
 0x4f7   :  { %3280 = vmatprep.subr.bf16.mxu1 %v3632_v58 }
 0x5c4   :  { %v2926_v52 = vpop.f32.mrb[6].mxu1 }
 0x5c5   :  { %v691_v53 = vadd.f32 %v2926_v52, %v2638_v51  ;;  %v685_v54 = vpop.f32.mrb[7].mxu1 }
 0x5c6   :  { %v686_v55 = vadd.f32 %v2638_v51, %v685_v54 }
 0x5c7   :  { %v695_v57 = vmax.f32 %v691_v53, 0.0 }
 0x5c8   :  { %v694_v56 = vmax.f32 %v686_v55, 0.0 }
 0x5ca   :  { %2935 = vmatprep.mubr.msk.f32.mxu1 %vm181_vm0, %v694_v56 }
 0x5cb   :  { %2936 = vmatmul.mubr.msk.f32.vlgmr.msra.gmra.mrb[8].mxu1 %vm181_vm0, %v695_v57  ;;  %v1186_v57 = vld [vmem:[#allocation11 + $0x70] sm:$0xff] }
 0x5cc   :  { %2970 = vmatprep.mubr.msk.f32.mxu1 %vm3633_vm2, %v3634_v59  ;;  %3282 = vmatpush3.bf16.msra.mxu1 %v3281_v10 }
 0x5cd   :  { %3283 = vmatprep.subr.bf16.mxu1 %v3632_v58 }
 0x5d0   :  { %3285 = vmatpush3.bf16.msra.mxu1 %v3284_v13 }
 0x5d1   :  { %3292 = vmatprep.subr.bf16.mxu1 %v3632_v58 }
 0x69e   :  { %v2937_v60 = vpop.f32.mrb[8].mxu1 }
 0x69f   :  { %v773_v61 = vpop.f32.mrb[9].mxu1 }
 0x6a0   :  { %v3270_v62 = vpack.c.bf16 %v2937_v60, %v773_v61  ;;  %v1187_v60 = vld [vmem:[#allocation11 + $0x78] sm:$0xff] }
 0x6a1   :  { %v3296_v61 = vpack.c.bf16 %v1187_v60, %v1186_v57  ;;  %v1605_v57 = vld [vmem:[#allocation11 + $0xe8] sm:$0xff] }
 0x6a2   :  { %3271 = vmatprep.subr.bf16.mxu0 %v3270_v62 }
 0x6a3   :  { %3273 = vmatpush3.bf16.msra.mxu0 %v3270_v62  ;;  %v1289_v62 = vld [vmem:[#allocation11 + $0x80] sm:$0xff] }
 0x6a4   :  { %3274 = vmatprep.subr.bf16.mxu0 %v3632_v58  ;;  %v3299_v0 = vpack.c.bf16 %v1290_v63, %v1289_v62 }
 0x6a6   :  { %2943 = vmatmul.mubr.msk.f32.vlgmr.msra.gmra.mrb[4].mxu0 %vm270_vm1, %v3876_v15  ;;  %v1080_v15 = vld [vmem:[#allocation11 + $0x48] sm:$0xff] }
 0x6a7   :  { %3276 = vmatpush3.bf16.msra.mxu0 %v3275_v1  ;;  %2953 = vmatprep.mubr.msk.f32.mxu0 %vm3633_vm2, %v3634_v59  ;;  %v3287_v16 = vpack.c.bf16 %v1080_v15, %v1079_v14  ;;  %v2654_v1 = vld [vmem:[#allocation13 + $0x2] ss:$0 sm:$0xff]  ;;  %v1291_v14 = vld [vmem:[#allocation11 + $0x90] sm:$0xff]  ;;  %v1292_v15 = vld [vmem:[#allocation11 + $0x98] sm:$0xff] }
 0x6a8   :  { %3277 = vmatprep.subr.bf16.mxu0 %v3632_v58 }
 0x6ab   :  { %3279 = vmatpush3.bf16.msra.mxu0 %v3278_v4 }
 0x6ac   :  { %3286 = vmatprep.subr.bf16.mxu0 %v3632_v58 }
 0x6ae   :  { %2954 = vmatmul.mubr.msk.f32.vlgmr.msra.gmra.mrb[6].mxu0 %vm181_vm0, %v867_v5 }
 0x6af   :  { %2956 = vmatprep.mubr.msk.f32.mxu0 %vm3633_vm2, %v3634_v59  ;;  %3288 = vmatpush3.bf16.msra.mxu0 %v3287_v16  ;;  %v3302_v16 = vpack.c.bf16 %v1292_v15, %v1291_v14  ;;  %v1709_v14 = vld [vmem:[%s4173_s3 + $0x8] sm:$0xff]  ;;  %v1710_v15 = vld [vmem:[%s4173_s3 + $0x10] sm:$0xff] }
 0x6b0   :  { %3289 = vmatprep.subr.bf16.mxu0 %v3632_v58 }
 0x6b2   :  { %2957 = vmatmul.mubr.msk.f32.gmra.mrb[8].mxu0 %vm181_vm0, %v868_v6 }
 0x6b3   :  { %2959 = vmatprep.mubr.msk.f32.mxu0 %vm3633_vm2, %v3634_v59  ;;  %3291 = vmatpush3.bf16.msra.mxu0 %v3290_v40  ;;  %v2662_v40 = vld [vmem:[#allocation13 + $0x4] ss:$0 sm:$0xff] }
 0x6b4   :  { %3298 = vmatprep.subr.bf16.mxu0 %v3632_v58 }
 0x6b6   :  { %2960 = vmatmul.mubr.msk.f32.gmra.mrb[10].mxu0 %vm181_vm0, %v869_v7 }
 0x6b7   :  { %2987 = vmatprep.mubr.msk.f32.mxu0 %vm3633_vm2, %v3634_v59 }
 0x779   :  { %v2944_v18 = vpop.f32.mrb[4].mxu0 }
 0x77a   :  { %v862_v19 = vadd.f32 %v2944_v18, %v2643_v17  ;;  %v856_v20 = vpop.f32.mrb[5].mxu0  ;;  %v1395_v18 = vld [vmem:[#allocation11 + $0xa8] sm:$0xff] }
 0x77b   :  { %v857_v21 = vadd.f32 %v2643_v17, %v856_v20  ;;  %v1394_v17 = vld [vmem:[#allocation11 + $0xa0] sm:$0xff] }
 0x77c   :  { %v866_v22 = vmax.f32 %v862_v19, 0.0  ;;  %v3305_v19 = vpack.c.bf16 %v1395_v18, %v1394_v17  ;;  %v2658_v20 = vld [vmem:[#allocation13 + $0x3] ss:$0 sm:$0xff] }
 0x77d   :  { %v865_v23 = vmax.f32 %v857_v21, 0.0 }
 0x77f   :  { %v3914_v24 = vpack.c.bf16 %v866_v22, %v865_v23 }
 0x781   :  { %v956_v26 = vpop.f32.mrb[6].mxu0 }
 0x782   :  { %v957_v27 = vadd.f32 %v2646_v25, %v956_v26  ;;  %v2955_v28 = vpop.f32.mrb[7].mxu0 }
 0x784   :  { %v970_v29 = vmax.f32 %v957_v27, 0.0 }
 0x785   :  { %v961_v30 = vpop.f32.mrb[8].mxu0 }
 0x786   :  { %v962_v31 = vadd.f32 %v2646_v25, %v961_v30  ;;  %v2958_v32 = vpop.f32.mrb[9].mxu0  ;;  %2971 = vmatmul.mubr.msk.f32.vlgmr.msra.gmra.mrb[10].mxu1 %vm181_vm0, %v970_v29 }
 0x787   :  { %2973 = vmatprep.mubr.msk.f32.mxu1 %vm3633_vm2, %v3634_v59  ;;  %3294 = vmatpush3.bf16.msra.mxu1 %v3293_v43 }
 0x788   :  { %v971_v33 = vmax.f32 %v962_v31, 0.0  ;;  %3295 = vmatprep.subr.bf16.mxu1 %v3632_v58 }
 0x789   :  { %v966_v34 = vpop.f32.mrb[10].mxu0 }
 0x78a   :  { %v967_v35 = vadd.f32 %v2646_v25, %v966_v34  ;;  %v2961_v36 = vpop.f32.mrb[11].mxu0  ;;  %2974 = vmatmul.mubr.msk.f32.gmra.mrb[12].mxu1 %vm181_vm0, %v971_v33  ;;  %v1396_v34 = vld [vmem:[#allocation11 + $0xb0] sm:$0xff] }
 0x78b   :  { %2976 = vmatprep.mubr.msk.f32.mxu1 %vm3633_vm2, %v3634_v59  ;;  %3297 = vmatpush3.bf16.msra.mxu1 %v3296_v61  ;;  %v2666_v61 = vld [vmem:[#allocation13 + $0x5] ss:$0 sm:$0xff] }
 0x78c   :  { %v972_v37 = vmax.f32 %v967_v35, 0.0  ;;  %3304 = vmatprep.subr.bf16.mxu1 %v3632_v58  ;;  %v1397_v35 = vld [vmem:[#allocation11 + $0xb8] sm:$0xff] }
 0x78d   :  { %v3308_v36 = vpack.c.bf16 %v1397_v35, %v1396_v34  ;;  %v1892_v35 = vld [vmem:[%s4179_s9] sm:$0xff] }
 0x78e   :  { %2977 = vmatmul.mubr.msk.f32.gmra.mrb[14].mxu1 %vm181_vm0, %v972_v37  ;;  %v1499_v37 = vld [vmem:[#allocation11 + $0xc0] sm:$0xff] }
 0x78f   :  { %3004 = vmatprep.mubr.msk.f32.mxu1 %vm3633_vm2, %v3634_v59  ;;  %v3311_v39 = vpack.c.bf16 %v1500_v38, %v1499_v37  ;;  %v2686_v38 = vld [vmem:[%s4179_s9 + $0x30] sm:$0xff] }
 0x859   :  { %v1061_v45 = vpop.f32.mrb[10].mxu1 }
 0x85a   :  { %v1062_v46 = vadd.f32 %v2650_v44, %v1061_v45  ;;  %v2972_v47 = vpop.f32.mrb[11].mxu1 }
 0x85c   :  { %v1075_v48 = vmax.f32 %v1062_v46, 0.0 }
 0x85d   :  { %v1066_v49 = vpop.f32.mrb[12].mxu1 }
 0x85e   :  { %v1067_v50 = vadd.f32 %v2650_v44, %v1066_v49  ;;  %v2975_v51 = vpop.f32.mrb[13].mxu1  ;;  %2988 = vmatmul.mubr.msk.f32.vlgmr.msra.gmra.mrb[12].mxu0 %vm181_vm0, %v1075_v48 }
 0x85f   :  { %2990 = vmatprep.mubr.msk.f32.mxu0 %vm3633_vm2, %v3634_v59  ;;  %3300 = vmatpush3.bf16.msra.mxu0 %v3299_v0 }
 0x860   :  { %v1076_v52 = vmax.f32 %v1067_v50, 0.0  ;;  %3301 = vmatprep.subr.bf16.mxu0 %v3632_v58 }
 0x861   :  { %v1071_v53 = vpop.f32.mrb[14].mxu1 }
 0x862   :  { %v1072_v54 = vadd.f32 %v2650_v44, %v1071_v53  ;;  %v2978_v55 = vpop.f32.mrb[15].mxu1  ;;  %2991 = vmatmul.mubr.msk.f32.gmra.mrb[14].mxu0 %vm181_vm0, %v1076_v52  ;;  %v1501_v53 = vld [vmem:[#allocation11 + $0xd0] sm:$0xff] }
 0x863   :  { %2993 = vmatprep.mubr.msk.f32.mxu0 %vm3633_vm2, %v3634_v59  ;;  %3303 = vmatpush3.bf16.msra.mxu0 %v3302_v16  ;;  %v2670_v16 = vld [vmem:[#allocation13 + $0x6] ss:$0 sm:$0xff] }
 0x864   :  { %v1077_v56 = vmax.f32 %v1072_v54, 0.0  ;;  %3310 = vmatprep.subr.bf16.mxu0 %v3632_v58  ;;  %v1502_v54 = vld [vmem:[#allocation11 + $0xd8] sm:$0xff] }
 0x865   :  { %v3314_v55 = vpack.c.bf16 %v1502_v54, %v1501_v53  ;;  %v2694_v54 = vld [vmem:[%s4179_s9 + $0x40] sm:$0xff] }
 0x866   :  { %2994 = vmatmul.mubr.msk.f32.gmra.mrb[16].mxu0 %vm181_vm0, %v1077_v56  ;;  %v1604_v56 = vld [vmem:[#allocation11 + $0xe0] sm:$0xff] }
 0x867   :  { %3021 = vmatprep.mubr.msk.f32.mxu0 %vm3633_vm2, %v3634_v59  ;;  %v3317_v60 = vpack.c.bf16 %v1605_v57, %v1604_v56 }
 0x931   :  { %v1166_v2 = vpop.f32.mrb[12].mxu0 }
 0x932   :  { %v1167_v3 = vadd.f32 %v2654_v1, %v1166_v2  ;;  %v2989_v4 = vpop.f32.mrb[13].mxu0 }
 0x934   :  { %v1180_v5 = vmax.f32 %v1167_v3, 0.0 }
 0x935   :  { %v1171_v6 = vpop.f32.mrb[14].mxu0 }
 0x936   :  { %v1172_v7 = vadd.f32 %v2654_v1, %v1171_v6  ;;  %v2992_v8 = vpop.f32.mrb[15].mxu0  ;;  %3005 = vmatmul.mubr.msk.f32.vlgmr.msra.gmra.mrb[16].mxu1 %vm181_vm0, %v1180_v5 }
 0x937   :  { %3007 = vmatprep.mubr.msk.f32.mxu1 %vm3633_vm2, %v3634_v59  ;;  %3306 = vmatpush3.bf16.msra.mxu1 %v3305_v19 }
 0x938   :  { %v1181_v9 = vmax.f32 %v1172_v7, 0.0  ;;  %3307 = vmatprep.subr.bf16.mxu1 %v3632_v58 }
 0x939   :  { %v1176_v10 = vpop.f32.mrb[16].mxu0 }
 0x93a   :  { %v1177_v11 = vadd.f32 %v2654_v1, %v1176_v10  ;;  %v2995_v12 = vpop.f32.mrb[17].mxu0  ;;  %3008 = vmatmul.mubr.msk.f32.gmra.mrb[18].mxu1 %vm181_vm0, %v1181_v9  ;;  %v1606_v10 = vld [vmem:[#allocation11 + $0xf0] sm:$0xff] }
 0x93b   :  { %3010 = vmatprep.mubr.msk.f32.mxu1 %vm3633_vm2, %v3634_v59  ;;  %3309 = vmatpush3.bf16.msra.mxu1 %v3308_v36  ;;  %v1893_v36 = vld [vmem:[%s4179_s9 + $0x8] sm:$0xff] }
 0x93c   :  { %v1182_v13 = vmax.f32 %v1177_v11, 0.0  ;;  %3316 = vmatprep.subr.bf16.mxu1 %v3632_v58  ;;  %v1607_v11 = vld [vmem:[#allocation11 + $0xf8] sm:$0xff]  ;;  %v3335_v37 = vpack.c.bf16 %v1893_v36, %v1892_v35 }
 0x93d   :  { %v3320_v12 = vpack.c.bf16 %v1607_v11, %v1606_v10 }
 0x93e   :  { %3011 = vmatmul.mubr.msk.f32.gmra.mrb[20].mxu1 %vm181_vm0, %v1182_v13  ;;  %v1708_v13 = vld [vmem:[%s4173_s3] sm:$0xff] }
 0x93f   :  { %3038 = vmatprep.mubr.msk.f32.mxu1 %vm3633_vm2, %v3634_v59 }
 0xa09   :  { %v1271_v21 = vpop.f32.mrb[16].mxu1 }
 0xa0a   :  { %v1272_v22 = vadd.f32 %v2658_v20, %v1271_v21  ;;  %v3006_v23 = vpop.f32.mrb[17].mxu1 }
 0xa0c   :  { %v1285_v25 = vmax.f32 %v1272_v22, 0.0 }
 0xa0d   :  { %v1276_v26 = vpop.f32.mrb[18].mxu1 }
 0xa0e   :  { %v1277_v27 = vadd.f32 %v2658_v20, %v1276_v26  ;;  %v3009_v28 = vpop.f32.mrb[19].mxu1  ;;  %3022 = vmatmul.mubr.msk.f32.vlgmr.msra.gmra.mrb[18].mxu0 %vm181_vm0, %v1285_v25 }
 0xa0f   :  { %3024 = vmatprep.mubr.msk.f32.mxu0 %vm3633_vm2, %v3634_v59  ;;  %3312 = vmatpush3.bf16.msra.mxu0 %v3311_v39  ;;  %v2687_v39 = vld [vmem:[%s4179_s9 + $0x38] sm:$0xff] }
 0xa10   :  { %v1286_v29 = vmax.f32 %v1277_v27, 0.0  ;;  %3313 = vmatprep.subr.bf16.mxu0 %v3632_v58 }
 0xa11   :  { %v1281_v30 = vpop.f32.mrb[20].mxu1 }
 0xa12   :  { %v1282_v31 = vadd.f32 %v2658_v20, %v1281_v30  ;;  %v3012_v32 = vpop.f32.mrb[21].mxu1  ;;  %3025 = vmatmul.mubr.msk.f32.gmra.mrb[20].mxu0 %vm181_vm0, %v1286_v29  ;;  %v1801_v30 = vld [vmem:[%s4174_s4 + $0x8] sm:$0xff] }
 0xa13   :  { %3027 = vmatprep.mubr.msk.f32.mxu0 %vm3633_vm2, %v3634_v59  ;;  %3315 = vmatpush3.bf16.msra.mxu0 %v3314_v55  ;;  %v2684_v32 = vld [vmem:[%s4179_s9 + $0x20] sm:$0xff]  ;;  %v2695_v55 = vld [vmem:[%s4179_s9 + $0x48] sm:$0xff] }
 0xa14   :  { %v1287_v33 = vmax.f32 %v1282_v31, 0.0  ;;  %3322 = vmatprep.subr.bf16.mxu0 %v3632_v58  ;;  %v1802_v31 = vld [vmem:[%s4174_s4 + $0x10] sm:$0xff] }
 0xa16   :  { %3028 = vmatmul.mubr.msk.f32.gmra.mrb[22].mxu0 %vm181_vm0, %v1287_v33  ;;  %v2685_v33 = vld [vmem:[%s4179_s9 + $0x28] sm:$0xff] }
 0xa17   :  { %3055 = vmatprep.mubr.msk.f32.mxu0 %vm3633_vm2, %v3634_v59  ;;  %v3329_v34 = vpack.c.bf16 %v2685_v33, %v2684_v32 }
 0xae1   :  { %v1376_v41 = vpop.f32.mrb[18].mxu0 }
 0xae2   :  { %v1377_v42 = vadd.f32 %v2662_v40, %v1376_v41  ;;  %v3023_v43 = vpop.f32.mrb[19].mxu0  ;;  %v3332_v41 = vpack.c.bf16 %v2687_v39, %v2686_v38  ;;  %v2701_v38 = vld [vmem:[%s4180_s10] ss:$0 sm:$0xff] }
 0xae4   :  { %v1390_v44 = vmax.f32 %v1377_v42, 0.0  ;;  %v1895_v42 = vld [vmem:[%s4179_s9 + $0x18] sm:$0xff] }
 0xae5   :  { %v1381_v45 = vpop.f32.mrb[20].mxu0 }
 0xae6   :  { %v1382_v46 = vadd.f32 %v2662_v40, %v1381_v45  ;;  %v3026_v47 = vpop.f32.mrb[21].mxu0  ;;  %3039 = vmatmul.mubr.msk.f32.vlgmr.msra.gmra.mrb[22].mxu1 %vm181_vm0, %v1390_v44 }
 0xae7   :  { %3041 = vmatprep.mubr.msk.f32.mxu1 %vm3633_vm2, %v3634_v59  ;;  %3318 = vmatpush3.bf16.msra.mxu1 %v3317_v60  ;;  %v3341_v60 = vpack.c.bf16 %v2695_v55, %v2694_v54  ;;  %v2296_v54 = vld [vmem:[#allocation14 + $0x38] sm:$0xff] }
 0xae8   :  { %v1391_v48 = vmax.f32 %v1382_v46, 0.0  ;;  %3319 = vmatprep.subr.bf16.mxu1 %v3632_v58 }
 0xae9   :  { %v1386_v49 = vpop.f32.mrb[22].mxu0 }
 0xaea   :  { %v1387_v50 = vadd.f32 %v2662_v40, %v1386_v49  ;;  %v3029_v51 = vpop.f32.mrb[23].mxu0  ;;  %3042 = vmatmul.mubr.msk.f32.gmra.mrb[24].mxu1 %vm181_vm0, %v1391_v48  ;;  %v1894_v40 = vld [vmem:[%s4179_s9 + $0x10] sm:$0xff] }
 0xaeb   :  { %3044 = vmatprep.mubr.msk.f32.mxu1 %vm3633_vm2, %v3634_v59  ;;  %3321 = vmatpush3.bf16.msra.mxu1 %v3320_v12  ;;  %v3338_v43 = vpack.c.bf16 %v1895_v42, %v1894_v40 }
 0xaec   :  { %v1392_v52 = vmax.f32 %v1387_v50, 0.0  ;;  %3325 = vmatprep.subr.bf16.mxu1 %v3632_v58 }
 0xaee   :  { %3045 = vmatmul.mubr.msk.f32.gmra.mrb[26].mxu1 %vm181_vm0, %v1392_v52 }
 0xaef   :  { %3072 = vmatprep.mubr.msk.f32.mxu1 %vm3633_vm2, %v3634_v59 }
 0xbb9   :  { %v1481_v62 = vpop.f32.mrb[22].mxu1 }
 0xbba   :  { %v1482_v63 = vadd.f32 %v2666_v61, %v1481_v62  ;;  %v3040_v0 = vpop.f32.mrb[23].mxu1  ;;  %v2697_v62 = vld [vmem:[%s4179_s9 + $0x58] sm:$0xff] }
 0xbbc   :  { %v1495_v1 = vmax.f32 %v1482_v63, 0.0 }
 0xbbd   :  { %v1486_v2 = vpop.f32.mrb[24].mxu1 }
 0xbbe   :  { %v1487_v3 = vadd.f32 %v2666_v61, %v1486_v2  ;;  %v3043_v4 = vpop.f32.mrb[25].mxu1  ;;  %3056 = vmatmul.mubr.msk.f32.vlgmr.msra.gmra.mrb[24].mxu0 %vm181_vm0, %v1495_v1  ;;  %v2674_v2 = vld [vmem:[#allocation13 + $0x7] ss:$0 sm:$0xff] }
 0xbbf   :  { %3324 = vmatpush3.bf16.msra.mxu0 %v3914_v24  ;;  %3058 = vmatprep.mubr.msk.f32.mxu0 %vm3633_vm2, %v3634_v59 }
 0xbc0   :  { %v1496_v5 = vmax.f32 %v1487_v3, 0.0  ;;  %3328 = vmatprep.subr.bf16.mxu0 %v3632_v58 }
 0xbc1   :  { %v1491_v6 = vpop.f32.mrb[26].mxu1 }
 0xbc2   :  { %v1492_v7 = vadd.f32 %v2666_v61, %v1491_v6  ;;  %v3046_v8 = vpop.f32.mrb[27].mxu1  ;;  %3059 = vmatmul.mubr.msk.f32.gmra.mrb[26].mxu0 %vm181_vm0, %v1496_v5  ;;  %v2696_v61 = vld [vmem:[%s4179_s9 + $0x50] sm:$0xff] }
 0xbc3   :  { %3061 = vmatprep.mubr.msk.f32.mxu0 %vm3633_vm2, %v3634_v59  ;;  %v3344_v1 = vpack.c.bf16 %v2697_v62, %v2696_v61  ;;  %v2702_v61 = vld [vmem:[#allocation16] ss:$0 sm:$0xff] }
 0xbc4   :  { %v1497_v9 = vmax.f32 %v1492_v7, 0.0 }
 0xbc6   :  { %3062 = vmatmul.mubr.msk.f32.gmra.mrb[28].mxu0 %vm181_vm0, %v1497_v9 }
 0xbc7   :  { %3085 = vmatprep.mubr.msk.f32.mxu0 %vm3633_vm2, %v3634_v59 }
 0xbca   :  { %3086 = vmatmul.mubr.msk.f32.vlgmr.msra.gmra.mrb[30].mxu0 %vm270_vm1, %v1708_v13 }
 0xbcb   :  { %3088 = vmatprep.mubr.msk.f32.mxu0 %vm3633_vm2, %v3634_v59  ;;  %3330 = vmatpush3.bf16.msra.mxu0 %v3329_v34 }
 0xbcc   :  { %3331 = vmatprep.subr.bf16.mxu0 %v3632_v58 }
 0xbce   :  { %3089 = vmatmul.mubr.msk.f32.gmra.mrb[32].mxu0 %vm270_vm1, %v1709_v14 }
 0xbcf   :  { %3091 = vmatprep.mubr.msk.f32.mxu0 %vm3633_vm2, %v3634_v59  ;;  %3333 = vmatpush3.bf16.msra.mxu0 %v3332_v41 }
 0xbd0   :  { %3340 = vmatprep.subr.bf16.mxu0 %v3632_v58 }
 0xbd2   :  { %3092 = vmatmul.mubr.msk.f32.gmra.mrb[34].mxu0 %vm270_vm1, %v1710_v15 }
 0xbd3   :  { %3115 = vmatprep.mubr.msk.f32.mxu0 %vm3633_vm2, %v3634_v59 }
 0xc91   :  { %v1586_v17 = vpop.f32.mrb[24].mxu0 }
 0xc92   :  { %v1587_v18 = vadd.f32 %v2670_v16, %v1586_v17  ;;  %v3057_v19 = vpop.f32.mrb[25].mxu0  ;;  %v2189_v17 = vld [vmem:[#allocation14] sm:$0xff] }
 0xc94   :  { %v1600_v20 = vmax.f32 %v1587_v18, 0.0  ;;  %v2190_v18 = vld [vmem:[#allocation14 + $0x8] sm:$0xff] }
 0xc95   :  { %v1591_v21 = vpop.f32.mrb[26].mxu0  ;;  %v3347_v19 = vpack.c.bf16 %v2190_v18, %v2189_v17 }
 0xc96   :  { %v1592_v22 = vadd.f32 %v2670_v16, %v1591_v21  ;;  %v3060_v23 = vpop.f32.mrb[27].mxu0  ;;  %3073 = vmatmul.mubr.msk.f32.vlgmr.msra.gmra.mrb[28].mxu1 %vm181_vm0, %v1600_v20 }
 0xc97   :  { %3327 = vmatpush3.bf16.msra.mxu1 %v3914_v24  ;;  %3075 = vmatprep.mubr.msk.f32.mxu1 %vm3633_vm2, %v3634_v59  ;;  %v1800_v24 = vld [vmem:[%s4174_s4] sm:$0xff] }
 0xc98   :  { %v1601_v25 = vmax.f32 %v1592_v22, 0.0  ;;  %3334 = vmatprep.subr.bf16.mxu1 %v3632_v58  ;;  %v2191_v22 = vld [vmem:[#allocation14 + $0x10] sm:$0xff]  ;;  %v2192_v23 = vld [vmem:[#allocation14 + $0x18] sm:$0xff] }
 0xc99   :  { %v1596_v26 = vpop.f32.mrb[28].mxu0 }
 0xc9a   :  { %v1597_v27 = vadd.f32 %v2670_v16, %v1596_v26  ;;  %v3063_v28 = vpop.f32.mrb[29].mxu0  ;;  %3076 = vmatmul.mubr.msk.f32.gmra.mrb[30].mxu1 %vm181_vm0, %v1601_v25  ;;  %v3350_v25 = vpack.c.bf16 %v2192_v23, %v2191_v22  ;;  %v2293_v26 = vld [vmem:[#allocation14 + $0x20] sm:$0xff] }
 0xc9b   :  { %3078 = vmatprep.mubr.msk.f32.mxu1 %vm3633_vm2, %v3634_v59 }
 0xc9c   :  { %v1602_v29 = vmax.f32 %v1597_v27, 0.0  ;;  %v2294_v27 = vld [vmem:[#allocation14 + $0x28] sm:$0xff] }
 0xc9d   :  { %v1786_v44 = vpop.f32.mrb[30].mxu0  ;;  %v3353_v28 = vpack.c.bf16 %v2294_v27, %v2293_v26 }
 0xc9e   :  { %3079 = vmatmul.mubr.msk.f32.gmra.mrb[32].mxu1 %vm181_vm0, %v1602_v29  ;;  %v3087_v45 = vpop.f32.mrb[31].mxu0 }
 0xc9f   :  { %3098 = vmatprep.mubr.msk.f32.mxu1 %vm3633_vm2, %v3634_v59 }
 0xca1   :  { %v1791_v46 = vpop.f32.mrb[32].mxu0 }
 0xca2   :  { %3099 = vmatmul.mubr.msk.f32.vlgmr.msra.gmra.mrb[34].mxu1 %vm270_vm1, %v1800_v24  ;;  %v3090_v47 = vpop.f32.mrb[33].mxu0 }
 0xca3   :  { %3101 = vmatprep.mubr.msk.f32.mxu1 %vm3633_vm2, %v3634_v59  ;;  %3336 = vmatpush3.bf16.msra.mxu1 %v3335_v37 }
 0xca4   :  { %3337 = vmatprep.subr.bf16.mxu1 %v3632_v58 }
 0xca5   :  { %v1796_v48 = vpop.f32.mrb[34].mxu0 }
 0xca6   :  { %3102 = vmatmul.mubr.msk.f32.gmra.mrb[36].mxu1 %vm270_vm1, %v1801_v30  ;;  %v3093_v49 = vpop.f32.mrb[35].mxu0 }
 0xca7   :  { %3104 = vmatprep.mubr.msk.f32.mxu1 %vm3633_vm2, %v3634_v59  ;;  %3339 = vmatpush3.bf16.msra.mxu1 %v3338_v43 }
 0xca8   :  { %3346 = vmatprep.subr.bf16.mxu1 %v3632_v58 }
 0xcaa   :  { %3105 = vmatmul.mubr.msk.f32.gmra.mrb[38].mxu1 %vm270_vm1, %v1802_v31 }
 0xcab   :  { %3132 = vmatprep.mubr.msk.f32.mxu1 %vm3633_vm2, %v3634_v59 }
 0xcae   :  { %3133 = vmatmul.mubr.msk.f32.vlgmr.msra.gmra.mrb[40].mxu1 %vm181_vm0, %v1786_v44 }
 0xcaf   :  { %3135 = vmatprep.mubr.msk.f32.mxu1 %vm3633_vm2, %v3634_v59  ;;  %3348 = vmatpush3.bf16.msra.mxu1 %v3347_v19 }
 0xcb0   :  { %3349 = vmatprep.subr.bf16.mxu1 %v3632_v58 }
 0xcb2   :  { %3136 = vmatmul.mubr.msk.f32.gmra.mrb[42].mxu1 %vm181_vm0, %v1791_v46 }
 0xcb3   :  { %3138 = vmatprep.mubr.msk.f32.mxu1 %vm3633_vm2, %v3634_v59  ;;  %3351 = vmatpush3.bf16.msra.mxu1 %v3350_v25 }
 0xcb4   :  { %3358 = vmatprep.subr.bf16.mxu1 %v3632_v58 }
 0xcb6   :  { %3139 = vmatmul.mubr.msk.f32.gmra.mrb[44].mxu1 %vm181_vm0, %v1796_v48 }
 0xcb7   :  { %3166 = vmatprep.mubr.msk.f32.mxu1 %vm3633_vm2, %v3634_v59 }
 0xd69   :  { %v1691_v50 = vpop.f32.mrb[28].mxu1 }
 0xd6a   :  { %v3074_v51 = vpop.f32.mrb[29].mxu1  ;;  %v1692_v5 = vadd.f32 %v2674_v2, %v1691_v50 }
 0xd6c   :  { %v1705_v8 = vmax.f32 %v1692_v5, 0.0 }
 0xd6d   :  { %v1696_v52 = vpop.f32.mrb[30].mxu1 }
 0xd6e   :  { %v3077_v53 = vpop.f32.mrb[31].mxu1  ;;  %v1697_v9 = vadd.f32 %v2674_v2, %v1696_v52 }
 0xd6f   :  { %v2295_v53 = vld [vmem:[#allocation14 + $0x30] sm:$0xff] }
 0xd70   :  { %v1706_v10 = vmax.f32 %v1697_v9, 0.0  ;;  %v3356_v55 = vpack.c.bf16 %v2296_v54, %v2295_v53 }
 0xd71   :  { %v1701_v56 = vpop.f32.mrb[32].mxu1 }
 0xd72   :  { %v3080_v57 = vpop.f32.mrb[33].mxu1  ;;  %v1702_v11 = vadd.f32 %v2674_v2, %v1701_v56  ;;  %v2398_v56 = vld [vmem:[#allocation14 + $0x40] sm:$0xff] }
 0xd73   :  { %v2399_v57 = vld [vmem:[#allocation14 + $0x48] sm:$0xff] }
 0xd74   :  { %v1707_v12 = vmax.f32 %v1702_v11, 0.0  ;;  %v2401_v11 = vld [vmem:[#allocation14 + $0x58] sm:$0xff] }
 0xd75   :  { %v1878_v63 = vpop.f32.mrb[34].mxu1 }
 0xd76   :  { %v3100_v0 = vpop.f32.mrb[35].mxu1  ;;  %3116 = vmatmul.mubr.msk.f32.vlgmr.msra.gmra.mrb[36].mxu0 %vm181_vm0, %v1878_v63 }
 0xd77   :  { %3342 = vmatpush3.bf16.msra.mxu0 %v3341_v60  ;;  %3118 = vmatprep.mubr.msk.f32.mxu0 %vm3633_vm2, %v3634_v59  ;;  %v3359_v60 = vpack.c.bf16 %v2399_v57, %v2398_v56 }
 0xd78   :  { %3343 = vmatprep.subr.bf16.mxu0 %v3632_v58 }
 0xd79   :  { %v1883_v3 = vpop.f32.mrb[36].mxu1 }
 0xd7a   :  { %v3103_v4 = vpop.f32.mrb[37].mxu1  ;;  %3119 = vmatmul.mubr.msk.f32.gmra.mrb[38].mxu0 %vm181_vm0, %v1883_v3 }
 0xd7b   :  { %3121 = vmatprep.mubr.msk.f32.mxu0 %vm3633_vm2, %v3634_v59  ;;  %3345 = vmatpush3.bf16.msra.mxu0 %v3344_v1 }
 0xd7c   :  { %3352 = vmatprep.subr.bf16.mxu0 %v3632_v58 }
 0xd7d   :  { %v1888_v6 = vpop.f32.mrb[38].mxu1 }
 0xd7e   :  { %v3106_v7 = vpop.f32.mrb[39].mxu1  ;;  %3122 = vmatmul.mubr.msk.f32.gmra.mrb[40].mxu0 %vm181_vm0, %v1888_v6 }
 0xd7f   :  { %3149 = vmatprep.mubr.msk.f32.mxu0 %vm3633_vm2, %v3634_v59 }
 0xd81   :  { %v2065_v13 = vpop.f32.mrb[40].mxu1 }
 0xd82   :  { %3150 = vmatmul.mubr.msk.f32.vlgmr.msra.gmra.mrb[42].mxu0 %vm181_vm0, %v1705_v8  ;;  %v3134_v14 = vpop.f32.mrb[41].mxu1 }
 0xd83   :  { %3152 = vmatprep.mubr.msk.f32.mxu0 %vm3633_vm2, %v3634_v59  ;;  %3354 = vmatpush3.bf16.msra.mxu0 %v3353_v28  ;;  %v2503_v14 = vld [vmem:[%s4183_s13 + $0x8] sm:$0xff] }
 0xd84   :  { %3355 = vmatprep.subr.bf16.mxu0 %v3632_v58 }
 0xd85   :  { %v2070_v15 = vpop.f32.mrb[42].mxu1 }
 0xd86   :  { %3153 = vmatmul.mubr.msk.f32.gmra.mrb[44].mxu0 %vm181_vm0, %v1706_v10  ;;  %v3137_v16 = vpop.f32.mrb[43].mxu1  ;;  %v2400_v10 = vld [vmem:[#allocation14 + $0x50] sm:$0xff] }
 0xd87   :  { %3155 = vmatprep.mubr.msk.f32.mxu0 %vm3633_vm2, %v3634_v59  ;;  %3357 = vmatpush3.bf16.msra.mxu0 %v3356_v55  ;;  %v2706_v16 = vld [vmem:[#allocation16 + $0x1] ss:$0 sm:$0xff] }
 0xd88   :  { %3364 = vmatprep.subr.bf16.mxu0 %v3632_v58 }
 0xd89   :  { %v2075_v20 = vpop.f32.mrb[44].mxu1 }
 0xd8a   :  { %3156 = vmatmul.mubr.msk.f32.gmra.mrb[46].mxu0 %vm181_vm0, %v1707_v12  ;;  %v3140_v21 = vpop.f32.mrb[45].mxu1  ;;  %v3362_v12 = vpack.c.bf16 %v2401_v11, %v2400_v10 }
 0xd8b   :  { %3183 = vmatprep.mubr.msk.f32.mxu0 %vm3633_vm2, %v3634_v59 }
 0xe49   :  { %v1976_v29 = vpop.f32.mrb[36].mxu0 }
 0xe4a   :  { %v3117_v24 = vpop.f32.mrb[37].mxu0  ;;  %v2066_v30 = vadd.f32 %v2065_v13, %v1976_v29  ;;  %v2502_v13 = vld [vmem:[%s4183_s13] sm:$0xff]  ;;  %v2504_v29 = vld [vmem:[%s4183_s13 + $0x10] sm:$0xff] }
 0xe4b   :  { %v2505_v24 = vld [vmem:[%s4183_s13 + $0x18] sm:$0xff] }
 0xe4d   :  { %v1981_v31 = vpop.f32.mrb[38].mxu0 }
 0xe4e   :  { %v3120_v32 = vpop.f32.mrb[39].mxu0  ;;  %v2071_v33 = vadd.f32 %v2070_v15, %v1981_v31  ;;  %v3365_v15 = vpack.c.bf16 %v2503_v14, %v2502_v13  ;;  %v2710_v31 = vld [vmem:[#allocation16 + $0x2] ss:$0 sm:$0xff] }
 0xe51   :  { %v1986_v34 = vpop.f32.mrb[40].mxu0 }
 0xe52   :  { %v3123_v35 = vpop.f32.mrb[41].mxu0  ;;  %v2076_v36 = vadd.f32 %v2075_v20, %v1986_v34 }
 0xe55   :  { %v2159_v37 = vpop.f32.mrb[42].mxu0 }
 0xe56   :  { %v2173_v39 = vadd.f32 %v2159_v37, %v2066_v30  ;;  %v3151_v40 = vpop.f32.mrb[43].mxu0  ;;  %v3368_v30 = vpack.c.bf16 %v2505_v24, %v2504_v29 }
 0xe58   :  { %v2183_v41 = vadd.f32 %v2701_v38, %v2173_v39 }
 0xe59   :  { %v2164_v42 = vpop.f32.mrb[44].mxu0 }
 0xe5a   :  { %v2186_v43 = vmax.f32 %v2183_v41, 0.0  ;;  %v2174_v44 = vadd.f32 %v2164_v42, %v2071_v33  ;;  %v3154_v45 = vpop.f32.mrb[45].mxu0 }
 0xe5c   :  { %v2184_v46 = vadd.f32 %v2701_v38, %v2174_v44  ;;  %3167 = vmatmul.mubr.msk.f32.vlgmr.msra.gmra.mrb[46].mxu1 %vm181_vm0, %v2186_v43  ;;  %v2714_v44 = vld [vmem:[%s4184_s14] ss:$0 sm:$0xff] }
 0xe5d   :  { %v2169_v47 = vpop.f32.mrb[46].mxu0  ;;  %3169 = vmatprep.mubr.msk.f32.mxu1 %vm3633_vm2, %v3634_v59  ;;  %3360 = vmatpush3.bf16.msra.mxu1 %v3359_v60 }
 0xe5e   :  { %v2187_v48 = vmax.f32 %v2184_v46, 0.0  ;;  %v2175_v49 = vadd.f32 %v2169_v47, %v2076_v36  ;;  %v3157_v50 = vpop.f32.mrb[47].mxu0  ;;  %3361 = vmatprep.subr.bf16.mxu1 %v3632_v58 }
 0xe60   :  { %v2185_v51 = vadd.f32 %v2701_v38, %v2175_v49  ;;  %3170 = vmatmul.mubr.msk.f32.gmra.mrb[48].mxu1 %vm181_vm0, %v2187_v48 }
 0xe61   :  { %3172 = vmatprep.mubr.msk.f32.mxu1 %vm3633_vm2, %v3634_v59  ;;  %3363 = vmatpush3.bf16.msra.mxu1 %v3362_v12 }
 0xe62   :  { %v2188_v52 = vmax.f32 %v2185_v51, 0.0 }
 0xe64   :  { %3173 = vmatmul.mubr.msk.f32.gmra.mrb[50].mxu1 %vm181_vm0, %v2188_v52 }
 0xe65   :  { %3200 = vmatprep.mubr.msk.f32.mxu1 %vm3633_vm2, %v3634_v59 }
 0xf2f   :  { %v2275_v62 = vpop.f32.mrb[46].mxu1 }
 0xf30   :  { %v2276_v63 = vadd.f32 %v2702_v61, %v2275_v62  ;;  %v3168_v0 = vpop.f32.mrb[47].mxu1 }
 0xf32   :  { %v2289_v1 = vmax.f32 %v2276_v63, 0.0 }
 0xf33   :  { %v2280_v2 = vpop.f32.mrb[48].mxu1 }
 0xf34   :  { %v2281_v3 = vadd.f32 %v2702_v61, %v2280_v2  ;;  %v3171_v4 = vpop.f32.mrb[49].mxu1  ;;  %3184 = vmatmul.mubr.msk.f32.vlgmr.msra.gmra.mrb[48].mxu0 %vm181_vm0, %v2289_v1 }
 0xf35   :  { %3186 = vmatprep.mubr.msk.f32.mxu0 %vm3633_vm2, %v3634_v59  ;;  %3366 = vmatpush3.bf16.msra.mxu0 %v3365_v15 }
 0xf36   :  { %v2290_v5 = vmax.f32 %v2281_v3, 0.0  ;;  %3367 = vmatprep.subr.bf16.mxu0 %v3632_v58 }
 0xf37   :  { %v2285_v6 = vpop.f32.mrb[50].mxu1 }
 0xf38   :  { %v2286_v7 = vadd.f32 %v2702_v61, %v2285_v6  ;;  %v3174_v8 = vpop.f32.mrb[51].mxu1  ;;  %3187 = vmatmul.mubr.msk.f32.gmra.mrb[50].mxu0 %vm181_vm0, %v2290_v5 }
 0xf39   :  { %3189 = vmatprep.mubr.msk.f32.mxu0 %vm3633_vm2, %v3634_v59  ;;  %3369 = vmatpush3.bf16.msra.mxu0 %v3368_v30 }
 0xf3a   :  { %v2291_v9 = vmax.f32 %v2286_v7, 0.0 }
 0xf3c   :  { %3190 = vmatmul.mubr.msk.f32.gmra.mrb[52].mxu0 %vm181_vm0, %v2291_v9 }
 0xf3d   :  { %3217 = vmatprep.mubr.msk.f32.mxu0 %vm3633_vm2, %v3634_v59 }
0x1007   :  { %v2380_v17 = vpop.f32.mrb[48].mxu0 }
0x1008   :  { %v2381_v18 = vadd.f32 %v2706_v16, %v2380_v17  ;;  %v3185_v19 = vpop.f32.mrb[49].mxu0 }
0x100a   :  { %v2394_v20 = vmax.f32 %v2381_v18, 0.0 }
0x100b   :  { %v2385_v21 = vpop.f32.mrb[50].mxu0 }
0x100c   :  { %v2386_v22 = vadd.f32 %v2706_v16, %v2385_v21  ;;  %v3188_v23 = vpop.f32.mrb[51].mxu0  ;;  %3201 = vmatmul.mubr.msk.f32.vlgmr.msra.gmra.mrb[52].mxu1 %vm181_vm0, %v2394_v20 }
0x100d   :  { %3203 = vmatprep.mubr.msk.f32.mxu1 %vm3633_vm2, %v3634_v59 }
0x100e   :  { %v2395_v25 = vmax.f32 %v2386_v22, 0.0 }
0x100f   :  { %v2390_v26 = vpop.f32.mrb[52].mxu0 }
0x1010   :  { %v2391_v27 = vadd.f32 %v2706_v16, %v2390_v26  ;;  %v3191_v28 = vpop.f32.mrb[53].mxu0  ;;  %3204 = vmatmul.mubr.msk.f32.gmra.mrb[54].mxu1 %vm181_vm0, %v2395_v25 }
0x1011   :  { %3206 = vmatprep.mubr.msk.f32.mxu1 %vm3633_vm2, %v3634_v59 }
0x1012   :  { %v2396_v58 = vmax.f32 %v2391_v27, 0.0 }
0x1014   :  { %3207 = vmatmul.mubr.msk.f32.gmra.mrb[56].mxu1 %vm181_vm0, %v2396_v58 }
0x10df   :  { %v2485_v32 = vpop.f32.mrb[52].mxu1 }
0x10e0   :  { %v2486_v33 = vadd.f32 %v2710_v31, %v2485_v32  ;;  %v3202_v34 = vpop.f32.mrb[53].mxu1 }
0x10e2   :  { %v2499_v35 = vmax.f32 %v2486_v33, 0.0 }
0x10e3   :  { %v2490_v36 = vpop.f32.mrb[54].mxu1 }
0x10e4   :  { %v2491_v37 = vadd.f32 %v2710_v31, %v2490_v36  ;;  %v3205_v38 = vpop.f32.mrb[55].mxu1  ;;  %3218 = vmatmul.mubr.msk.f32.vlgmr.msra.gmra.mrb[54].mxu0 %vm181_vm0, %v2499_v35 }
0x10e5   :  { %3220 = vmatprep.mubr.msk.f32.mxu0 %vm3633_vm2, %v3634_v59 }
0x10e6   :  { %v2500_v39 = vmax.f32 %v2491_v37, 0.0 }
0x10e7   :  { %v2495_v40 = vpop.f32.mrb[56].mxu1 }
0x10e8   :  { %v2496_v41 = vadd.f32 %v2710_v31, %v2495_v40  ;;  %v3208_v42 = vpop.f32.mrb[57].mxu1  ;;  %3221 = vmatmul.mubr.msk.f32.gmra.mrb[56].mxu0 %vm181_vm0, %v2500_v39 }
0x10e9   :  { %3223 = vmatprep.mubr.msk.f32.mxu0 %vm3633_vm2, %v3634_v59 }
0x10ea   :  { %v2501_v43 = vmax.f32 %v2496_v41, 0.0 }
0x10ec   :  { %3224 = vmatmul.mubr.msk.f32.gmra.mrb[58].mxu0 %vm181_vm0, %v2501_v43 }
0x11b7   :  { %v2588_v45 = vpop.f32.mrb[54].mxu0 }
0x11b8   :  { %v2589_v46 = vadd.f32 %v2714_v44, %v2588_v45  ;;  %v3219_v47 = vpop.f32.mrb[55].mxu0 }
0x11ba   :  { %2602 = vst [vmem:[#allocation17] sm:$0xff] %v2589_v46 }
0x11bb   :  { %v2593_v48 = vpop.f32.mrb[56].mxu0 }
0x11bc   :  { %v2594_v49 = vadd.f32 %v2714_v44, %v2593_v48  ;;  %v3222_v50 = vpop.f32.mrb[57].mxu0 }
0x11be   :  { %2603 = vst [vmem:[#allocation17 + $0x8] sm:$0xff] %v2594_v49 }
0x11bf   :  { %v2598_v51 = vpop.f32.mrb[58].mxu0 }
0x11c0   :  { %v2599_v52 = vadd.f32 %v2714_v44, %v2598_v51  ;;  %v3225_v59 = vpop.f32.mrb[59].mxu0 }
0x11c2   :  { %2604 = vst [vmem:[#allocation17 + $0x10] sm:$0xff] %v2599_v52 }
0x11c3   :  { %3596 = shalt.err (!%p3593_p6)
}
0x11c4   :  { %s3597_s2 = scalar_lea.hbm %s4185_s15, 384 }
0x11c5   :  { %p3598_p7 = scmp.ne.s32.totalorder %s4185_s15, %s3597_s2  ;;  %p3601_p8 = scmp.lt.u32.totalorder %s3597_s2, %s4185_s15 }
0x11c7   :  { %p3603_p9 = pnand %p3601_p8, %p3598_p7 }
0x11c9   :  { %3606 = shalt.err (!%p3603_p9)
}
0x11ca   :  { %2616 = dma.vmem_to_hbm [thread:$0]  %s2611_s8, 384, %s4185_s15, [#allocation4], %s3621_s30, %s3621_s30, %s3622_s16  }
0x11cb   :  { %3617 = dma.done.wait [#allocation4], 384  }
0x11cc   :  { %3618 = vsyncadd [#allocation4], 4294966912 }
0x11cd   :  { %2620 = vsyncpa [#allocation3], 1 }
0x11ce   :  { %2621 = vsyncpa [#allocation6], 1 }
0x11cf   :  { %2622 = vsyncpa [#allocation9], 1 }
0x11d0   :  { %2623 = vsyncpa [#allocation12], 1 }
0x11d1   :  { %2624 = vsyncpa [#allocation15], 1 }
0x11d2   :  { %2625 = vsyncpa [#allocation4], 1 }

</bundles_post_ra>
